<compile_context>
chip_gen: v7x
topology: tpu7x:2x2x1
jax: 0.10.0
libtpu: 0.0.40
codegen_flags: <defaults>
</compile_context>

<pallas_src>
import functools

import jax
import jax.numpy as jnp
from jax.experimental import pallas as pl
from jax.experimental.pallas import tpu as pltpu


# ----------------------------------------------------------------------------
# Fused Pallas kernel (one grid step == one graph)
# ----------------------------------------------------------------------------
def _gat_model_kernel(x_ref, adj_ref, wpack_ref, bpack_ref, o_ref, *,
                      hidden: int, f_in: int, c_out: int, w_offs):
    """Fused forward: 3x GATConv(+ReLU) -> global max pool -> Linear.

    x_ref    : [1, N, Fin]        bf16 node features (this graph)
    adj_ref  : [1, N, N]          bf16 mask; adj[i, j] != 0 iff edge j -> i
    wpack_ref: [Rw, H+2]          bf16 packed [w1_aug; w2_aug; w3_aug; w_lin]
    bpack_ref: [4, max(H, C)]     f32 packed [b1; b2; b3; b_lin]
    o_ref    : [1, 1, C]          f32 graph logits
    """
    o1, o2, o3, olin = w_offs

    x = x_ref[0]                                  # [N, Fin] bf16
    # Boolean neighborhood mask, built once per graph, shared by all layers.
    mask = adj_ref[0] > 0.0                       # [N, N] bool

    # Static slices into the packed parameter buffers (zero-cost views).
    w1 = wpack_ref[o1:o1 + f_in, :]               # [Fin, H+2] bf16
    w2 = wpack_ref[o2:o2 + hidden, :]             # [H,   H+2] bf16
    w3 = wpack_ref[o3:o3 + hidden, :]             # [H,   H+2] bf16
    wlin = wpack_ref[olin:olin + hidden, :c_out]  # [H, C]     bf16
    b1 = bpack_ref[0:1, :hidden]                  # [1, H] f32
    b2 = bpack_ref[1:2, :hidden]
    b3 = bpack_ref[2:3, :hidden]
    blin = bpack_ref[3:4, :c_out]                 # [1, C] f32

    def gat_layer(h_in_bf16, w_aug, bias, apply_relu):
        # One bf16 MXU pass (f32 accumulate) produces projection AND logits:
        #   cols [0, H) -> h = x @ W ;  col H -> a_src ;  col H+1 -> a_dst
        h_aug = jnp.dot(h_in_bf16, w_aug,
                        preferred_element_type=jnp.float32)      # [N, H+2] f32
        h = h_aug[:, :hidden]                                     # [N, H]
        a_src = h_aug[:, hidden:hidden + 1]                       # [N, 1]
        a_dst = h_aug[:, hidden + 1:hidden + 2]                   # [N, 1]

        # e[i, j] = LeakyReLU(a_dst[i] + a_src[j], 0.2); mask via one select.
        e = a_dst + jnp.transpose(a_src)                          # [N, N] f32
        e = jnp.where(e > 0, e, 0.2 * e)
        e = jnp.where(mask, e, -1e9)

        # Row-wise softmax (strictly f32) over incoming neighbors of each dst.
        e = e - jnp.max(e, axis=-1, keepdims=True)
        p = jnp.exp(e)
        denom = jnp.sum(p, axis=-1, keepdims=True)
        alpha = p * pl.reciprocal(denom, approx=True)             # [N, N] f32

        # bf16 MXU aggregation, f32 accumulate, f32 bias.
        out = jnp.dot(alpha.astype(jnp.bfloat16), h.astype(jnp.bfloat16),
                      preferred_element_type=jnp.float32) + bias
        if apply_relu:
            out = jnp.maximum(out, 0.0)
        return out

    h = gat_layer(x, w1, b1, apply_relu=True)
    h = gat_layer(h.astype(jnp.bfloat16), w2, b2, apply_relu=True)
    h = gat_layer(h.astype(jnp.bfloat16), w3, b3, apply_relu=False)

    # global_max_pool (single graph) + Linear.
    # F.dropout(p=0.25, training=False) is the identity in eval mode.
    pooled = jnp.max(h, axis=0, keepdims=True)                    # [1, H] f32
    logits = jnp.dot(pooled.astype(jnp.bfloat16), wlin,
                     preferred_element_type=jnp.float32) + blin   # [1, C]
    o_ref[0] = logits


# ----------------------------------------------------------------------------
# One-time parameter packing (hoisted out of the per-forward path)
# ----------------------------------------------------------------------------
def _augment_weight(w, att_src, att_dst):
    """[Fin, H] -> [Fin, H+2]: fold both attention reductions into the matmul."""
    return jnp.concatenate(
        [w, w @ att_src.reshape(-1, 1), w @ att_dst.reshape(-1, 1)], axis=1)


def _round_up(v, m):
    return ((v + m - 1) // m) * m


def prepare_params(params):
    """Call once per parameter set.

    Augments the GAT weights, then coalesces all weights into one bf16 buffer
    and all biases into one f32 buffer (2 DMAs per kernel call instead of 8,
    and no per-call augmentation matmuls/concats).
    """
    f_in, hidden = params["w1"].shape
    c_out = params["w_lin"].shape[1]

    w1 = _augment_weight(params["w1"], params["asrc1"], params["adst1"])
    w2 = _augment_weight(params["w2"], params["asrc2"], params["adst2"])
    w3 = _augment_weight(params["w3"], params["asrc3"], params["adst3"])
    blocks = [w1, w2, w3, params["w_lin"]]

    width = max(hidden + 2, c_out)
    offs, off = [], 0
    for w in blocks:
        offs.append(off)
        off += _round_up(w.shape[0], 16)          # 16-row align (bf16 packing)
    wpack = jnp.zeros((off, width), jnp.float32)
    for w, o in zip(blocks, offs):
        wpack = wpack.at[o:o + w.shape[0], :w.shape[1]].set(w)

    bwidth = max(hidden, c_out)
    bpack = jnp.zeros((4, bwidth), jnp.float32)
    bpack = bpack.at[0, :hidden].set(params["b1"][0])
    bpack = bpack.at[1, :hidden].set(params["b2"][0])
    bpack = bpack.at[2, :hidden].set(params["b3"][0])
    bpack = bpack.at[3, :c_out].set(params["b_lin"][0])

    return {
        "wpack": wpack.astype(jnp.bfloat16),
        "bpack": bpack,
        "w_offs": tuple(offs),
        "f_in": f_in,
        "hidden": hidden,
        "c_out": c_out,
    }


# ----------------------------------------------------------------------------
# Batched wrapper
# ----------------------------------------------------------------------------
def gat_model_forward(x, adj, prepared):
    """Batched GATModel forward (eval mode, pooling='max').

    x   : [B, N, Fin]   node features (any float dtype; cast to bf16)
    adj : [B, N, N]     adj[b, i, j] != 0 iff edge j -> i; self-loops REQUIRED.
    Returns [B, num_classes] f32 graph logits.
    """
    bsz, n, f_in = x.shape
    hidden, c_out = prepared["hidden"], prepared["c_out"]
    assert f_in == prepared["f_in"]
    assert adj.shape == (bsz, n, n)
    # Dense [N, N] attention block must fit comfortably in VMEM / vregs.
    assert n <= 1024, "tile over destination rows (online softmax) for larger N"

    x = x.astype(jnp.bfloat16)
    adj = adj.astype(jnp.bfloat16)
    wpack, bpack = prepared["wpack"], prepared["bpack"]

    kernel = functools.partial(
        _gat_model_kernel, hidden=hidden, f_in=f_in, c_out=c_out,
        w_offs=prepared["w_offs"])

    # Advisory cost estimate so XLA can schedule surrounding ops around the
    # latency-bound custom call.
    per_graph_flops = (2 * n * f_in * (hidden + 2)           # layer 1 projection
                       + 2 * 2 * n * hidden * (hidden + 2)   # layers 2/3 projection
                       + 3 * 2 * n * n * hidden              # 3x alpha @ h
                       + 2 * hidden * c_out                   # final linear
                       + 3 * 6 * n * n)                       # mask/leaky/softmax
    bytes_accessed = (int(x.size) * 2 + int(adj.size) * 2
                      + int(wpack.size) * 2 + int(bpack.size) * 4
                      + bsz * c_out * 4)

    out = pl.pallas_call(
        kernel,
        out_shape=jax.ShapeDtypeStruct((bsz, 1, c_out), jnp.float32),
        grid_spec=pltpu.PrefetchScalarGridSpec(
            num_scalar_prefetch=0,
            grid=(bsz,),
            in_specs=[
                pl.BlockSpec((1, n, f_in), lambda g: (g, 0, 0)),   # x (per graph)
                pl.BlockSpec((1, n, n), lambda g: (g, 0, 0)),      # adj (per graph)
                pl.BlockSpec(wpack.shape, lambda g: (0, 0)),       # weights (broadcast)
                pl.BlockSpec(bpack.shape, lambda g: (0, 0)),       # biases (broadcast)
            ],
            out_specs=pl.BlockSpec((1, 1, c_out), lambda g: (g, 0, 0)),
        ),
        compiler_params=pltpu.CompilerParams(
            dimension_semantics=("parallel",)),   # megacore-shard batch on v7x
        cost_estimate=pl.CostEstimate(
            flops=bsz * per_graph_flops,
            transcendentals=bsz * (3 * n * n + 3 * n),
            bytes_accessed=bytes_accessed),
    )(x, adj, wpack, bpack)

    return out.reshape(bsz, c_out)


# ----------------------------------------------------------------------------
# Deterministic parameter init + example run
# ----------------------------------------------------------------------------
def _glorot(key, shape):
    fan_in, fan_out = shape[0], shape[-1]
    limit = (6.0 / (fan_in + fan_out)) ** 0.5
    return jax.random.uniform(key, shape, jnp.float32, -limit, limit)


def make_params(key, input_dim, hidden, num_classes):
    keys = jax.random.split(key, 16)
    p = {}
    # GAT1: input_dim -> hidden
    p["w1"] = _glorot(keys[0], (input_dim, hidden))
    p["asrc1"] = _glorot(keys[1], (1, hidden))
    p["adst1"] = _glorot(keys[2], (1, hidden))
    p["b1"] = jnp.zeros((1, hidden), jnp.float32)
    # GAT2: hidden -> hidden
    p["w2"] = _glorot(keys[3], (hidden, hidden))
    p["asrc2"] = _glorot(keys[4], (1, hidden))
    p["adst2"] = _glorot(keys[5], (1, hidden))
    p["b2"] = jnp.zeros((1, hidden), jnp.float32)
    # GAT3: hidden -> hidden
    p["w3"] = _glorot(keys[6], (hidden, hidden))
    p["asrc3"] = _glorot(keys[7], (1, hidden))
    p["adst3"] = _glorot(keys[8], (1, hidden))
    p["b3"] = jnp.zeros((1, hidden), jnp.float32)
    # Final Linear: hidden -> num_classes  (stored as [hidden, num_classes])
    p["w_lin"] = _glorot(keys[9], (hidden, num_classes))
    p["b_lin"] = jnp.zeros((1, num_classes), jnp.float32)
    return p


def make_graph(key, num_nodes, num_edges):
    """Deterministic random graph; dense mask adj[dst, src]=1 + self loops."""
    k_src, k_dst = jax.random.split(key)
    src = jax.random.randint(k_src, (num_edges,), 0, num_nodes)
    dst = jax.random.randint(k_dst, (num_edges,), 0, num_nodes)
    adj = jnp.zeros((num_nodes, num_nodes), jnp.float32)
    adj = adj.at[dst, src].set(1.0)
    # add_self_loops (duplicate edges collapse in the dense mask form)
    adj = jnp.maximum(adj, jnp.eye(num_nodes, dtype=jnp.float32))
    return adj


if __name__ == "__main__":
    BATCH = 4            # graphs per call (grid axis, pipelined + megacore)
    NUM_NODES = 64
    NUM_EDGES = 256
    INPUT_DIM = 16
    HIDDEN = 32          # hidden_channels * heads, divisible by 16 (GroupNorm groups)
    NUM_CLASSES = 8

    key = jax.random.PRNGKey(0)
    k_x, k_g, k_p = jax.random.split(key, 3)

    x = jax.random.normal(k_x, (BATCH, NUM_NODES, INPUT_DIM), jnp.float32)
    g_keys = jax.random.split(k_g, BATCH)
    adj = jnp.stack([make_graph(g_keys[i], NUM_NODES, NUM_EDGES)
                     for i in range(BATCH)], axis=0)

    params = make_params(k_p, INPUT_DIM, HIDDEN, NUM_CLASSES)
    prepared = prepare_params(params)        # one-time packing / augmentation

    out = gat_model_forward(x, adj, prepared)
    out = jax.block_until_ready(out)
    assert out.shape == (BATCH, NUM_CLASSES)
    assert jnp.all(jnp.isfinite(out))
    print("KERNEL_OK")
</pallas_src>

<mosaic_0001>
module attributes {stable_mosaic.version = 11 : i64} {
  func.func @_gat_model_kernel(%arg0: i32, %arg1: memref<1x64x16xbf16, #tpu.memory_space<vmem>>, %arg2: memref<1x64x64xbf16, #tpu.memory_space<vmem>>, %arg3: memref<112x34xbf16, #tpu.memory_space<vmem>>, %arg4: memref<4x32xf32, #tpu.memory_space<vmem>>, %arg5: memref<1x1x8xf32, #tpu.memory_space<vmem>>) attributes {dimension_semantics = [#tpu.dimension_semantics<parallel>], iteration_bounds = array<i64: 4>, scalar_prefetch = 0 : i64, scratch_operands = 0 : i64, tpu.core_type = #tpu.core_type<tc>, window_params = [{transform_indices = @transform_0, window_bounds = array<i64: 1, 64, 16>}, {transform_indices = @transform_1, window_bounds = array<i64: 1, 64, 64>}, {pipeline_mode = #tpu.pipeline_mode<synchronous>, transform_indices = @transform_2, window_bounds = array<i64: 112, 34>}, {pipeline_mode = #tpu.pipeline_mode<synchronous>, transform_indices = @transform_3, window_bounds = array<i64: 4, 32>}, {transform_indices = @transform_4, window_bounds = array<i64: 1, 1, 8>}]} {
    %c0 = arith.constant 0 : index
    %c0_0 = arith.constant 0 : index
    %c0_1 = arith.constant 0 : index
    %0 = vector.load %arg1[%c0, %c0_0, %c0_1] : memref<1x64x16xbf16, #tpu.memory_space<vmem>>, vector<1x64x16xbf16>
    %1 = vector.shape_cast %0 : vector<1x64x16xbf16> to vector<64x16xbf16>
    %c0_2 = arith.constant 0 : index
    %c0_3 = arith.constant 0 : index
    %c0_4 = arith.constant 0 : index
    %2 = vector.load %arg2[%c0_2, %c0_3, %c0_4] : memref<1x64x64xbf16, #tpu.memory_space<vmem>>, vector<1x64x64xbf16>
    %3 = vector.shape_cast %2 : vector<1x64x64xbf16> to vector<64x64xbf16>
    %cst = arith.constant 0.000000e+00 : bf16
    %4 = vector.broadcast %cst : bf16 to vector<64x64xbf16>
    %5 = arith.cmpf ogt, %3, %4 : vector<64x64xbf16>
    %c0_5 = arith.constant 0 : index
    %c0_6 = arith.constant 0 : index
    %6 = vector.load %arg3[%c0_5, %c0_6] : memref<112x34xbf16, #tpu.memory_space<vmem>>, vector<16x34xbf16>
    %c16 = arith.constant 16 : index
    %c0_7 = arith.constant 0 : index
    %7 = vector.load %arg3[%c16, %c0_7] : memref<112x34xbf16, #tpu.memory_space<vmem>>, vector<32x34xbf16>
    %c48 = arith.constant 48 : index
    %c0_8 = arith.constant 0 : index
    %8 = vector.load %arg3[%c48, %c0_8] : memref<112x34xbf16, #tpu.memory_space<vmem>>, vector<32x34xbf16>
    %c80 = arith.constant 80 : index
    %c0_9 = arith.constant 0 : index
    %9 = vector.load %arg3[%c80, %c0_9] : memref<112x34xbf16, #tpu.memory_space<vmem>>, vector<32x8xbf16>
    %c0_10 = arith.constant 0 : index
    %c0_11 = arith.constant 0 : index
    %10 = vector.load %arg4[%c0_10, %c0_11] : memref<4x32xf32, #tpu.memory_space<vmem>>, vector<1x32xf32>
    %c1 = arith.constant 1 : index
    %c0_12 = arith.constant 0 : index
    %11 = vector.load %arg4[%c1, %c0_12] : memref<4x32xf32, #tpu.memory_space<vmem>>, vector<1x32xf32>
    %c2 = arith.constant 2 : index
    %c0_13 = arith.constant 0 : index
    %12 = vector.load %arg4[%c2, %c0_13] : memref<4x32xf32, #tpu.memory_space<vmem>>, vector<1x32xf32>
    %c3 = arith.constant 3 : index
    %c0_14 = arith.constant 0 : index
    %13 = vector.load %arg4[%c3, %c0_14] : memref<4x32xf32, #tpu.memory_space<vmem>>, vector<1x8xf32>
    %cst_15 = arith.constant dense<0.000000e+00> : vector<64x34xf32>
    %14 = tpu.matmul %1, %6, %cst_15 {dimension_numbers = #tpu.dot_dimension_numbers<[1], [0], [0], [1], [0, 0, 1, 1], [], []>} : vector<64x16xbf16>, vector<16x34xbf16>, vector<64x34xf32> -> vector<64x34xf32>
    %15 = vector.extract_strided_slice %14 {offsets = [0, 0], sizes = [64, 32], strides = [1, 1]} : vector<64x34xf32> to vector<64x32xf32>
    %16 = vector.extract_strided_slice %14 {offsets = [0, 32], sizes = [64, 1], strides = [1, 1]} : vector<64x34xf32> to vector<64x1xf32>
    %17 = vector.extract_strided_slice %14 {offsets = [0, 33], sizes = [64, 1], strides = [1, 1]} : vector<64x34xf32> to vector<64x1xf32>
    %18 = tpu.transpose %16, [1, 0] : vector<64x1xf32> -> vector<1x64xf32>
    %19 = vector.broadcast %17 : vector<64x1xf32> to vector<64x64xf32>
    %20 = vector.broadcast %18 : vector<1x64xf32> to vector<64x64xf32>
    %21 = arith.addf %19, %20 : vector<64x64xf32>
    %cst_16 = arith.constant 0.000000e+00 : f32
    %22 = vector.broadcast %cst_16 : f32 to vector<64x64xf32>
    %23 = arith.cmpf ogt, %21, %22 : vector<64x64xf32>
    %cst_17 = arith.constant 2.000000e-01 : f32
    %24 = vector.broadcast %cst_17 : f32 to vector<64x64xf32>
    %25 = arith.mulf %24, %21 : vector<64x64xf32>
    %26 = arith.select %23, %21, %25 : vector<64x64xi1>, vector<64x64xf32>
    %cst_18 = arith.constant -1.000000e+09 : f32
    %27 = vector.broadcast %cst_18 : f32 to vector<64x64xf32>
    %28 = arith.select %5, %26, %27 : vector<64x64xi1>, vector<64x64xf32>
    %cst_19 = arith.constant dense<0xFF800000> : vector<64xf32>
    %29 = vector.multi_reduction <maximumf>, %28, %cst_19 [1] : vector<64x64xf32> to vector<64xf32>
    %30 = vector.shape_cast %29 : vector<64xf32> to vector<64x1xf32>
    %31 = vector.broadcast %30 : vector<64x1xf32> to vector<64x64xf32>
    %32 = arith.subf %28, %31 : vector<64x64xf32>
    %33 = math.exp %32 : vector<64x64xf32>
    %cst_20 = arith.constant dense<0.000000e+00> : vector<64xf32>
    %34 = vector.multi_reduction <add>, %33, %cst_20 [1] : vector<64x64xf32> to vector<64xf32>
    %35 = vector.shape_cast %34 : vector<64xf32> to vector<64x1xf32>
    %36 = tpu.reciprocal %35 {approx = true} : vector<64x1xf32> -> vector<64x1xf32>
    %37 = vector.broadcast %36 : vector<64x1xf32> to vector<64x64xf32>
    %38 = arith.mulf %33, %37 : vector<64x64xf32>
    %39 = arith.truncf %38 : vector<64x64xf32> to vector<64x64xbf16>
    %40 = arith.truncf %15 : vector<64x32xf32> to vector<64x32xbf16>
    %cst_21 = arith.constant dense<0.000000e+00> : vector<64x32xf32>
    %41 = tpu.matmul %39, %40, %cst_21 {dimension_numbers = #tpu.dot_dimension_numbers<[1], [0], [0], [1], [0, 0, 1, 1], [], []>} : vector<64x64xbf16>, vector<64x32xbf16>, vector<64x32xf32> -> vector<64x32xf32>
    %42 = vector.broadcast %10 : vector<1x32xf32> to vector<64x32xf32>
    %43 = arith.addf %41, %42 : vector<64x32xf32>
    %cst_22 = arith.constant 0.000000e+00 : f32
    %44 = vector.broadcast %cst_22 : f32 to vector<64x32xf32>
    %45 = arith.maximumf %43, %44 : vector<64x32xf32>
    %46 = arith.truncf %45 : vector<64x32xf32> to vector<64x32xbf16>
    %cst_23 = arith.constant dense<0.000000e+00> : vector<64x34xf32>
    %47 = tpu.matmul %46, %7, %cst_23 {dimension_numbers = #tpu.dot_dimension_numbers<[1], [0], [0], [1], [0, 0, 1, 1], [], []>} : vector<64x32xbf16>, vector<32x34xbf16>, vector<64x34xf32> -> vector<64x34xf32>
    %48 = vector.extract_strided_slice %47 {offsets = [0, 0], sizes = [64, 32], strides = [1, 1]} : vector<64x34xf32> to vector<64x32xf32>
    %49 = vector.extract_strided_slice %47 {offsets = [0, 32], sizes = [64, 1], strides = [1, 1]} : vector<64x34xf32> to vector<64x1xf32>
    %50 = vector.extract_strided_slice %47 {offsets = [0, 33], sizes = [64, 1], strides = [1, 1]} : vector<64x34xf32> to vector<64x1xf32>
    %51 = tpu.transpose %49, [1, 0] : vector<64x1xf32> -> vector<1x64xf32>
    %52 = vector.broadcast %50 : vector<64x1xf32> to vector<64x64xf32>
    %53 = vector.broadcast %51 : vector<1x64xf32> to vector<64x64xf32>
    %54 = arith.addf %52, %53 : vector<64x64xf32>
    %cst_24 = arith.constant 0.000000e+00 : f32
    %55 = vector.broadcast %cst_24 : f32 to vector<64x64xf32>
    %56 = arith.cmpf ogt, %54, %55 : vector<64x64xf32>
    %cst_25 = arith.constant 2.000000e-01 : f32
    %57 = vector.broadcast %cst_25 : f32 to vector<64x64xf32>
    %58 = arith.mulf %57, %54 : vector<64x64xf32>
    %59 = arith.select %56, %54, %58 : vector<64x64xi1>, vector<64x64xf32>
    %cst_26 = arith.constant -1.000000e+09 : f32
    %60 = vector.broadcast %cst_26 : f32 to vector<64x64xf32>
    %61 = arith.select %5, %59, %60 : vector<64x64xi1>, vector<64x64xf32>
    %cst_27 = arith.constant dense<0xFF800000> : vector<64xf32>
    %62 = vector.multi_reduction <maximumf>, %61, %cst_27 [1] : vector<64x64xf32> to vector<64xf32>
    %63 = vector.shape_cast %62 : vector<64xf32> to vector<64x1xf32>
    %64 = vector.broadcast %63 : vector<64x1xf32> to vector<64x64xf32>
    %65 = arith.subf %61, %64 : vector<64x64xf32>
    %66 = math.exp %65 : vector<64x64xf32>
    %cst_28 = arith.constant dense<0.000000e+00> : vector<64xf32>
    %67 = vector.multi_reduction <add>, %66, %cst_28 [1] : vector<64x64xf32> to vector<64xf32>
    %68 = vector.shape_cast %67 : vector<64xf32> to vector<64x1xf32>
    %69 = tpu.reciprocal %68 {approx = true} : vector<64x1xf32> -> vector<64x1xf32>
    %70 = vector.broadcast %69 : vector<64x1xf32> to vector<64x64xf32>
    %71 = arith.mulf %66, %70 : vector<64x64xf32>
    %72 = arith.truncf %71 : vector<64x64xf32> to vector<64x64xbf16>
    %73 = arith.truncf %48 : vector<64x32xf32> to vector<64x32xbf16>
    %cst_29 = arith.constant dense<0.000000e+00> : vector<64x32xf32>
    %74 = tpu.matmul %72, %73, %cst_29 {dimension_numbers = #tpu.dot_dimension_numbers<[1], [0], [0], [1], [0, 0, 1, 1], [], []>} : vector<64x64xbf16>, vector<64x32xbf16>, vector<64x32xf32> -> vector<64x32xf32>
    %75 = vector.broadcast %11 : vector<1x32xf32> to vector<64x32xf32>
    %76 = arith.addf %74, %75 : vector<64x32xf32>
    %cst_30 = arith.constant 0.000000e+00 : f32
    %77 = vector.broadcast %cst_30 : f32 to vector<64x32xf32>
    %78 = arith.maximumf %76, %77 : vector<64x32xf32>
    %79 = arith.truncf %78 : vector<64x32xf32> to vector<64x32xbf16>
    %cst_31 = arith.constant dense<0.000000e+00> : vector<64x34xf32>
    %80 = tpu.matmul %79, %8, %cst_31 {dimension_numbers = #tpu.dot_dimension_numbers<[1], [0], [0], [1], [0, 0, 1, 1], [], []>} : vector<64x32xbf16>, vector<32x34xbf16>, vector<64x34xf32> -> vector<64x34xf32>
    %81 = vector.extract_strided_slice %80 {offsets = [0, 0], sizes = [64, 32], strides = [1, 1]} : vector<64x34xf32> to vector<64x32xf32>
    %82 = vector.extract_strided_slice %80 {offsets = [0, 32], sizes = [64, 1], strides = [1, 1]} : vector<64x34xf32> to vector<64x1xf32>
    %83 = vector.extract_strided_slice %80 {offsets = [0, 33], sizes = [64, 1], strides = [1, 1]} : vector<64x34xf32> to vector<64x1xf32>
    %84 = tpu.transpose %82, [1, 0] : vector<64x1xf32> -> vector<1x64xf32>
    %85 = vector.broadcast %83 : vector<64x1xf32> to vector<64x64xf32>
    %86 = vector.broadcast %84 : vector<1x64xf32> to vector<64x64xf32>
    %87 = arith.addf %85, %86 : vector<64x64xf32>
    %cst_32 = arith.constant 0.000000e+00 : f32
    %88 = vector.broadcast %cst_32 : f32 to vector<64x64xf32>
    %89 = arith.cmpf ogt, %87, %88 : vector<64x64xf32>
    %cst_33 = arith.constant 2.000000e-01 : f32
    %90 = vector.broadcast %cst_33 : f32 to vector<64x64xf32>
    %91 = arith.mulf %90, %87 : vector<64x64xf32>
    %92 = arith.select %89, %87, %91 : vector<64x64xi1>, vector<64x64xf32>
    %cst_34 = arith.constant -1.000000e+09 : f32
    %93 = vector.broadcast %cst_34 : f32 to vector<64x64xf32>
    %94 = arith.select %5, %92, %93 : vector<64x64xi1>, vector<64x64xf32>
    %cst_35 = arith.constant dense<0xFF800000> : vector<64xf32>
    %95 = vector.multi_reduction <maximumf>, %94, %cst_35 [1] : vector<64x64xf32> to vector<64xf32>
    %96 = vector.shape_cast %95 : vector<64xf32> to vector<64x1xf32>
    %97 = vector.broadcast %96 : vector<64x1xf32> to vector<64x64xf32>
    %98 = arith.subf %94, %97 : vector<64x64xf32>
    %99 = math.exp %98 : vector<64x64xf32>
    %cst_36 = arith.constant dense<0.000000e+00> : vector<64xf32>
    %100 = vector.multi_reduction <add>, %99, %cst_36 [1] : vector<64x64xf32> to vector<64xf32>
    %101 = vector.shape_cast %100 : vector<64xf32> to vector<64x1xf32>
    %102 = tpu.reciprocal %101 {approx = true} : vector<64x1xf32> -> vector<64x1xf32>
    %103 = vector.broadcast %102 : vector<64x1xf32> to vector<64x64xf32>
    %104 = arith.mulf %99, %103 : vector<64x64xf32>
    %105 = arith.truncf %104 : vector<64x64xf32> to vector<64x64xbf16>
    %106 = arith.truncf %81 : vector<64x32xf32> to vector<64x32xbf16>
    %cst_37 = arith.constant dense<0.000000e+00> : vector<64x32xf32>
    %107 = tpu.matmul %105, %106, %cst_37 {dimension_numbers = #tpu.dot_dimension_numbers<[1], [0], [0], [1], [0, 0, 1, 1], [], []>} : vector<64x64xbf16>, vector<64x32xbf16>, vector<64x32xf32> -> vector<64x32xf32>
    %108 = vector.broadcast %12 : vector<1x32xf32> to vector<64x32xf32>
    %109 = arith.addf %107, %108 : vector<64x32xf32>
    %cst_38 = arith.constant dense<0xFF800000> : vector<32xf32>
    %110 = vector.multi_reduction <maximumf>, %109, %cst_38 [0] : vector<64x32xf32> to vector<32xf32>
    %111 = vector.shape_cast %110 : vector<32xf32> to vector<1x32xf32>
    %112 = arith.truncf %111 : vector<1x32xf32> to vector<1x32xbf16>
    %cst_39 = arith.constant dense<0.000000e+00> : vector<1x8xf32>
    %113 = tpu.matmul %112, %9, %cst_39 {dimension_numbers = #tpu.dot_dimension_numbers<[1], [0], [0], [1], [0, 0, 1, 1], [], []>} : vector<1x32xbf16>, vector<32x8xbf16>, vector<1x8xf32> -> vector<1x8xf32>
    %114 = arith.addf %113, %13 : vector<1x8xf32>
    %c0_40 = arith.constant 0 : index
    %c0_41 = arith.constant 0 : index
    %c0_42 = arith.constant 0 : index
    %115 = vector.load %arg5[%c0_40, %c0_41, %c0_42] : memref<1x1x8xf32, #tpu.memory_space<vmem>>, vector<1x1x8xf32>
    %116 = vector.shape_cast %115 : vector<1x1x8xf32> to vector<1x8xf32>
    %117 = vector.shape_cast %114 : vector<1x8xf32> to vector<1x1x8xf32>
    tpu.vector_store %arg5[%c0_40, %c0_41, %c0_42], %117 {strides = array<i32>} : memref<1x1x8xf32, #tpu.memory_space<vmem>>, vector<1x1x8xf32>,
    return
  }
  func.func @transform_0(%arg0: i32) -> (i32, i32, i32) {
    %c0_i32 = arith.constant 0 : i32
    %c0_i32_0 = arith.constant 0 : i32
    %c0_i32_1 = arith.constant 0 : i32
    return %arg0, %c0_i32, %c0_i32_0 : i32, i32, i32
  }
  func.func @transform_1(%arg0: i32) -> (i32, i32, i32) {
    %c0_i32 = arith.constant 0 : i32
    %c0_i32_0 = arith.constant 0 : i32
    %c0_i32_1 = arith.constant 0 : i32
    return %arg0, %c0_i32, %c0_i32_0 : i32, i32, i32
  }
  func.func @transform_2(%arg0: i32) -> (i32, i32) {
    %c0_i32 = arith.constant 0 : i32
    %c0_i32_0 = arith.constant 0 : i32
    %c0_i32_1 = arith.constant 0 : i32
    return %c0_i32, %c0_i32_0 : i32, i32
  }
  func.func @transform_3(%arg0: i32) -> (i32, i32) {
    %c0_i32 = arith.constant 0 : i32
    %c0_i32_0 = arith.constant 0 : i32
    %c0_i32_1 = arith.constant 0 : i32
    return %c0_i32, %c0_i32_0 : i32, i32
  }
  func.func @transform_4(%arg0: i32) -> (i32, i32, i32) {
    %c0_i32 = arith.constant 0 : i32
    %c0_i32_0 = arith.constant 0 : i32
    %c0_i32_1 = arith.constant 0 : i32
    return %arg0, %c0_i32, %c0_i32_0 : i32, i32, i32
  }
}

</mosaic_0001>

<bundles_post_ra>
// kernel: tpu_custom_call.1
= control target key start
LH: loop header
LB: loop body
LE: loop exit
PB: predicated region body
PF: predicated region fallthrough
CT: control target
= control target key end

     0   :  { %9 = vsyncpa [#allocation3], 0  ;;  %s2504_s0 = inlined_call_operand.vmem [shape: bf16[4,64,16], index: 0, kind: input, shape index: {}]   ;;  %s2505_s1 = inlined_call_operand.vmem [shape: bf16[4,64,64], index: 1, kind: input, shape index: {}]   ;;  %s2506_s2 = inlined_call_operand.vmem [shape: bf16[112,34], index: 2, kind: input, shape index: {}]   ;;  %s2507_s3 = inlined_call_operand.vmem [shape: f32[4,32], index: 3, kind: input, shape index: {}]   ;;  %s2508_s4 = inlined_call_operand.hbm [shape: f32[4,1,8], index: 4, kind: output, shape index: {}]  }
   0x1   :  { %11 = vsyncpa [#allocation3 + $0x1], 0  ;;  %s2136_s15 = smov 0   ;;  %s2138_s16 = smov 0  }
   0x2   :  { %s2140_s17 = smov 0   ;;  %s2142_s18 = smov 0  }
   0x3 LB: > { %s2157_s19 = sadd.s32 4294967295, %s2103_s18   ;;  %s1702_s20 = sadd.s32 4294967294, %s2103_s18   ;;  %s2103_s18 = sphi %s2142_s18, %s2530_s18   ;;  %s2099_s17 = sphi %s2140_s17, %s2529_s17   ;;  %s2095_s16 = sphi %s2138_s16, %s2528_s16   ;;  %s2091_s15 = sphi %s2136_s15, %s2527_s15  }
   0x4   : > { %s2161_s21 = sadd.s32 1, %s2103_s18   ;;  %s118_s22 = sadd.s32 1, %s2099_s17 }
   0x5   : > { %s115_s23 = ssub.s32 %s2103_s18, %s2161_s21  ;;  %p128_p0 = scmp.ne.s32.totalorder %s2099_s17, %s2095_s16 }
   0x6   : > { %p116_p1 = scmp.eq.s32.totalorder %s115_s23, 0  ;;  %p129_p2 = scmp.eq.s32.totalorder %s2157_s19, 3 }
   0x7   : > { %p134_p3 = scmp.ne.s32.totalorder %s2095_s16, %s2091_s15  ;;  %p135_p4 = scmp.eq.s32.totalorder %s1702_s20, 3 }
   0x8   : > { %s2172_s24 = scalar_select %p116_p1, %s2099_s17, %s118_s22  }
   0x9   : > { %p2174_p5 = por %p129_p2, %p128_p0  ;;  %p2178_p6 = por %p135_p4, %p134_p3 }
   0xa   : > { %p1705_p7 = scmp.ge.s32.totalorder %s2103_s18, 1  ;;  %p175_p8 = scmp.lt.s32.totalorder %s2103_s18, 5 }
   0xc   : > { %p176_p9 = pnand %p1705_p7, %p175_p8 }
   0xd   : > { %v1934_v0 = vld [vmem:[%s2506_s2] sm:$0xff] (!%p176_p9)   ;;  %p205_p10 = scmp.lt.s32.totalorder (!%p176_p9), %s2157_s19, 3  ;;  %vm286_vm0 = vcmask (!%p176_p9), 130048   ;;  %v2105_v5 = vmov (!%p176_p9), 33   ;;  %s2106_s8 = smov (!%p176_p9), 96   ;;  %v460_v30 = vlaneseq (!%p176_p9)  ;;  %v2107_v35 = vmov (!%p176_p9), 0  }
   0xe   : > { %179 = sbr.rel (%p176_p9) target bundleno = 3358 (0xd1e), region = 36  ;;  %1798 = vmatprep.subr.bf16.mxu0 (!%p176_p9), %v1934_v0  ;;  %1933 = vset.pattern.permute.xlu1 (!%p176_p9), %v2105_v5  ;;  %vm528_vm8 = vcmask (!%p176_p9), 523264   ;;  %s203_s13 = sand.u32 (!%p176_p9), 1, %s2095_s16  }
   0xf   : > { %1799 = vmatpush3.bf16.msra.mxu0 (!%p176_p9), %v1934_v0  ;;  %1932 = vset.pattern.permute.xlu0 (!%p176_p9), %v2105_v5  ;;  %v461_v32 = vshrl.u32 (!%p176_p9), %v460_v30, 7  ;;  %s1749_s22 = sshll.u32 (!%p176_p9), %s2157_s19, 4  ;;  %s204_s23 = scalar_lea.vmem (!%p176_p9), [#allocation2], %s203_s13 }
  0x10   : > { %s1635_s27 = sshll.u32 (!%p176_p9), %s204_s23, 4  ;;  %s2110_s6 = smov (!%p176_p9), [#allocation2]   ;;  %s2464_s27 = int_to_ptr.vmem [resolvable:$true] %s1635_s27 }
  0x11   : > { %v2216_v34 = vsub.s32 (!%p176_p9), 0, %v461_v32  ;;  %s2041_s5 = scalar_lea.vmem (!%p176_p9), %s2464_s27, 16 }
  0x12   : > { %p2042_p11 = scmp.ne.s32.totalorder (!%p176_p9), %s2464_s27, %s2041_s5 }
  0x14   : > { %p2043_p12 = pnand (!%p176_p9), %p2042_p11, %p2174_p5 }
  0x15   : > { %s2189_s29 = scalar_select %p205_p10, %s2157_s19, 3 }
  0x16   : > { %s1623_s19 = scalar_lea.sflag [#allocation3], %s203_s13  ;;  %p2044_p13 = pneg %p2043_p12 }
  0x17   : > { %s1752_s30 = sshll.u32 %s2189_s29, 5 }
  0x18   : > { %s209_s7 = scalar_lea.vmem %s2504_s0, %s1752_s30  ;;  %s2212_s11 = scalar_lea.vmem %s2505_s1, %s1752_s30 }
  0x19   : > { %v1935_v1 = vld [vmem:[%s209_s7] sm:$0xff]   ;;  %v1936_v2 = vld [vmem:[%s209_s7 + $0x8] sm:$0xff]   ;;  %v1937_v3 = vld [vmem:[%s209_s7 + $0x10] sm:$0xff]   ;;  %s2462_s30 = scalar_lea.hbm %s2508_s4, %s1749_s22 }
  0x1a   : > { %1800 = vmatprep.mubr.msk.bf16.mxu0 %vm286_vm0, %v1935_v1  ;;  %v1938_v4 = vld [vmem:[%s209_s7 + $0x18] sm:$0xff]   ;;  %v226_v31 = vld [vmem:[%s2212_s11] sm:$0xf]  ;;  %v227_v33 = vld [vmem:[%s2212_s11 + $0x4] sm:$0xf]  ;;  %s2045_s7 = sshll.u32 %s2110_s6, 4  ;;  %s2046_s7 = int_to_ptr.vmem [resolvable:$false] %s2045_s7 }
  0x1b   : > { %1801 = vmatmul.mubr.msk.bf16.vlgmr.msra.gmra.mrb[0].mxu0 %vm286_vm0, %v1936_v2  ;;  %vm234_vm1 = vcmp.gt.bf16.partialorder %v226_v31, 0  ;;  %vm235_vm2 = vcmp.gt.bf16.partialorder %v227_v33, 0  ;;  %v228_v37 = vld [vmem:[%s2212_s11 + $0x8] sm:$0xf]  ;;  %v229_v38 = vld [vmem:[%s2212_s11 + $0xc] sm:$0xf]  ;;  %p2048_p0 = scmp.lt.s32.totalorder %s2464_s27, %s2046_s7 }
  0x1c   : > { %1804 = vmatprep.mubr.msk.bf16.mxu0 %vm286_vm0, %v1937_v3  ;;  %v496_v36 = vsel %vm234_vm1, 65537, %v2107_v35  ;;  %v497_v39 = vsel %vm235_vm2, 65537, %v2107_v35  ;;  %vm236_vm3 = vcmp.gt.bf16.partialorder %v228_v37, 0  ;;  %vm237_vm4 = vcmp.gt.bf16.partialorder %v229_v38, 0  ;;  %v230_v49 = vld [vmem:[%s2212_s11 + $0x10] sm:$0xf] }
  0x1d   : > { %v504_v42 = vunpack.c.l.b16 %v496_v36  ;;  %v505_v44 = vunpack.c.l.b16 %v497_v39  ;;  %v498_v48 = vsel %vm236_vm3, 65537, %v2107_v35  ;;  %v499_v51 = vsel %vm237_vm4, 65537, %v2107_v35  ;;  %v231_v63 = vld [vmem:[%s2212_s11 + $0x14] sm:$0xf] }
  0x1e   : > { %v506_v56 = vunpack.c.l.b16 %v498_v48  ;;  %vm238_vm10 = vcmp.gt.bf16.partialorder %v230_v49, 0  ;;  %v507_v1 = vunpack.c.l.b16 %v499_v51  ;;  %vm239_vm14 = vcmp.gt.bf16.partialorder %v231_v63, 0 }
  0x1f   : > { %vm2230_vm5 = vcmp.ne.s32.totalorder %v504_v42, 0  ;;  %vm2235_vm9 = vcmp.ne.s32.totalorder %v505_v44, 0  ;;  %v500_v2 = vsel %vm238_vm10, 65537, %v2107_v35 }
  0x20   : > { %vm2252_vm12 = vcmp.ne.s32.totalorder %v506_v56, 0  ;;  %vm2262_vm15 = vcmp.ne.s32.totalorder %v507_v1, 0 }
  0x23   : > { %1805 = vmatmul.mubr.msk.bf16.gmra.mrb[4].mxu0 %vm286_vm0, %v1938_v4 }
  0xee   : > { %v1802_v6 = vpop.f32.mrb[0].mxu0 }
  0xef   : > { %376 = vrot.lane.b32.xlu1 %v1802_v6, %s2106_s8  ;;  %v333_v7 = vpop.f32.mrb[1].mxu0 }
  0xf0   : > { %372 = vrot.lane.b32.xlu0 %v333_v7, %s2106_s8  ;;  %v1803_v8 = vpop.f32.mrb[2].mxu0 }
  0xf1   : > { %v622_v9 = vpack.c.bf16 %v1803_v8, %v1802_v6  ;;  %v336_v10 = vpop.f32.mrb[3].mxu0 }
  0xf2   : > { %v621_v11 = vpack.c.bf16 %v336_v10, %v333_v7 }
  0xf3   : > { %378 = vrot.lane.b32.xlu1 %v1803_v8, %s2106_s8 }
  0xf4   : > { %374 = vrot.lane.b32.xlu0 %v336_v10, %s2106_s8  ;;  %1808 = vmatprep.subr.bf16.mxu1 %v621_v11 }
  0xf5   : > { %1809 = vmatpush3.bf16.msra.mxu1 %v621_v11 }
  0xf6   : > { %v1806_v12 = vpop.f32.mrb[4].mxu0  ;;  %1810 = vmatprep.subr.bf16.mxu1 %v622_v9 }
  0xf7   : > { %433 = vperm.xlu1 %1933, %v336_v10   ;;  %v349_v13 = vpop.f32.mrb[5].mxu0 }
  0xf8   : > { %380 = vrot.lane.b32.xlu0 %v349_v13, %s2106_s8  ;;  %v1807_v14 = vpop.f32.mrb[6].mxu0 }
  0xf9   : > { %v624_v15 = vpack.c.bf16 %v1807_v14, %v1806_v12  ;;  %v352_v16 = vpop.f32.mrb[7].mxu0  ;;  %1811 = vmatpush3.bf16.msra.mxu1 %v622_v9 }
  0xfa   : > { %v623_v17 = vpack.c.bf16 %v352_v16, %v349_v13 }
  0xfb   : > { %437 = vperm.xlu1 %1933, %v1802_v6  }
  0xfc   : > { %384 = vrot.lane.b32.xlu0 %v1806_v12, %s2106_s8  ;;  %1812 = vmatprep.subr.bf16.mxu1 %v623_v17 }
  0xfd   : > { %1813 = vmatpush3.bf16.msra.mxu1 %v623_v17 }
  0xfe   : > { %1814 = vmatprep.subr.bf16.mxu1 %v624_v15 }
  0xff   : > { %453 = vperm.xlu1 %1933, %v1806_v12   ;;  %v508_v12 = vunpack.c.l.b16 %v500_v2 }
 0x100   : > { %429 = vperm.xlu0 %1932, %v333_v7  }
 0x101   : > { %1815 = vmatpush3.bf16.msra.mxu1 %v624_v15  ;;  %vm2271_vm2 = vcmp.ne.s32.totalorder %v508_v12, 0 }
 0x103   : > { %445 = vperm.xlu1 %1933, %v349_v13  }
 0x104   : > { %441 = vperm.xlu0 %1932, %v1803_v8   ;;  %v232_v8 = vld [vmem:[%s2212_s11 + $0x18] sm:$0xf] }
 0x105   : > { %vm240_vm1 = vcmp.gt.bf16.partialorder %v232_v8, 0 }
 0x107   : > { %386 = vrot.lane.b32.xlu1 %v1807_v14, %s2106_s8 }
 0x108   : > { %449 = vperm.xlu0 %1932, %v352_v16  }
 0x10b   : > { %382 = vrot.lane.b32.xlu1 %v352_v16, %s2106_s8  ;;  %v501_v16 = vsel %vm239_vm14, 65537, %v2107_v35  ;;  %vm730_vm14 = vcmask 261120  }
 0x10c   : > { %457 = vperm.xlu0 %1932, %v1807_v14  }
 0x161   : > { %v377_v20 = vpop.permute.xlu1 %376 }
 0x162   : > { %v373_v18 = vpop.permute.xlu0 %372 }
 0x163   : > { %396 = vxpose.xlu1.b32.start [1/8] (short) (narrow) %v373_v18, 8 }
 0x165   : > { %v379_v21 = vpop.permute.xlu1 %378 }
 0x166   : > { %v375_v19 = vpop.permute.xlu0 %374 }
 0x167   : > { %397 = vxpose.xlu1.b32.cont [2/8] (short) (narrow) %v375_v19, 8 }
 0x16a   : > { %v381_v22 = vpop.permute.xlu0 %380 }
 0x16b   : > { %398 = vxpose.xlu1.b32.cont [3/8] (short) (narrow) %v377_v20, 8  ;;  %v509_v20 = vunpack.c.l.b16 %v501_v16 }
 0x16e   : > { %v385_v29 = vpop.permute.xlu0 %384 }
 0x16f   : > { %399 = vxpose.xlu1.b32.cont [4/8] (short) (narrow) %v379_v21, 8  ;;  %v233_v21 = vld [vmem:[%s2212_s11 + $0x1c] sm:$0xf] }
 0x170   : > { %vm241_vm4 = vcmp.gt.bf16.partialorder %v233_v21, 0 }
 0x171   : > { %v503_v36 = vsel %vm241_vm4, 65537, %v2107_v35 }
 0x172   : > { %v511_v42 = vunpack.c.l.b16 %v503_v36 }
 0x173   : > { %400 = vxpose.xlu1.b32.cont [5/8] (short) (narrow) %v381_v22, 8 }
 0x176   : > { %v434_v23 = vpop.permute.xlu1 %433 }
 0x17a   : > { %v438_v24 = vpop.permute.xlu1 %437 }
 0x17e   : > { %v2205_v25 = vpop.permute.xlu1 %453 }
 0x17f   : > { %v430_v40 = vpop.permute.xlu0 %429 }
 0x182   : > { %v446_v26 = vpop.permute.xlu1 %445 }
 0x183   : > { %v442_v54 = vpop.permute.xlu0 %441 }
 0x186   : > { %v387_v27 = vpop.permute.xlu1 %386 }
 0x187   : > { %v450_v9 = vpop.permute.xlu0 %449 }
 0x18a   : > { %v383_v28 = vpop.permute.xlu1 %382 }
 0x18b   : > { %401 = vxpose.xlu1.b32.cont [6/8] (short) (narrow) %v383_v28, 8  ;;  %v458_v28 = vpop.permute.xlu0 %457 }
 0x18f   : > { %402 = vxpose.xlu1.b32.cont [7/8] (short) (narrow) %v385_v29, 8 }
 0x193   : > { %403 = vxpose.xlu1.b32.end [8/8] (short) (narrow) %v387_v27, 8 }
 0x1f7   : > { %v412_v41 = vpop.trf.xlu1 }
 0x1f8   : > { %v2223_v43 = vrot.slane %v412_v41, %v2216_v34 }
 0x1fa   : > { %v464_v45 = vadd.f32 %v2223_v43, %v430_v40  ;;  %v465_v46 = vadd.f32 %v2223_v43, %v434_v23  ;;  %v466_v47 = vadd.f32 %v2223_v43, %v438_v24  ;;  %v467_v60 = vadd.f32 %v2223_v43, %v442_v54 }
 0x1fb   : > { %v468_v6 = vadd.f32 %v2223_v43, %v446_v26  ;;  %v469_v15 = vadd.f32 %v2223_v43, %v450_v9  ;;  %v470_v24 = vadd.f32 %v2223_v43, %v2205_v25  ;;  %v502_v26 = vsel %vm240_vm1, 65537, %v2107_v35 }
 0x1fc   : > { %vm472_vm6 = vcmp.gt.f32.partialorder %v464_v45, 0.0  ;;  %v480_v52 = vmul.f32 0.2, %v464_v45  ;;  %vm473_vm7 = vcmp.gt.f32.partialorder %v465_v46, 0.0  ;;  %v481_v53 = vmul.f32 0.2, %v465_v46 }
 0x1fd   : > { %v482_v59 = vmul.f32 0.2, %v466_v47  ;;  %vm474_vm11 = vcmp.gt.f32.partialorder %v466_v47, 0.0  ;;  %v483_v5 = vmul.f32 0.2, %v467_v60  ;;  %vm475_vm13 = vcmp.gt.f32.partialorder %v467_v60, 0.0 }
 0x1fe   : > { %v488_v57 = vsel %vm472_vm6, %v464_v45, %v480_v52  ;;  %v489_v58 = vsel %vm473_vm7, %v465_v46, %v481_v53  ;;  %v484_v14 = vmul.f32 0.2, %v468_v6  ;;  %vm476_vm0 = vcmp.gt.f32.partialorder %v468_v6, 0.0 }
 0x1ff   : > { %v2242_v61 = vsel %vm2230_vm5, %v488_v57, -1e+09  ;;  %v2249_v0 = vsel %vm2235_vm9, %v489_v58, -1e+09  ;;  %v490_v3 = vsel %vm474_vm11, %v466_v47, %v482_v59  ;;  %v491_v13 = vsel %vm475_vm13, %v467_v60, %v483_v5 }
 0x200   : > { %v529_v62 = vsel %vm528_vm8, %v2242_v61, -inf  ;;  %v532_v7 = vsel %vm528_vm8, %v2249_v0, -inf  ;;  %v522_v10 = vsel %vm2252_vm12, %v490_v3, -1e+09  ;;  %v523_v18 = vsel %vm2262_vm15, %v491_v13, -1e+09 }
 0x201   : > { %530 = vmax.xlane.f32.xlu0 %v529_v62  ;;  %v535_v17 = vsel %vm528_vm8, %v522_v10, -inf  ;;  %v492_v22 = vsel %vm476_vm0, %v468_v6, %v484_v14  ;;  %v485_v23 = vmul.f32 0.2, %v469_v15  ;;  %vm477_vm3 = vcmp.gt.f32.partialorder %v469_v15, 0.0 }
 0x202   : > { %v538_v27 = vsel %vm528_vm8, %v523_v18, -inf  ;;  %v524_v29 = vsel %vm2271_vm2, %v492_v22, -1e+09  ;;  %v510_v30 = vunpack.c.l.b16 %v502_v26  ;;  %vm2282_vm6 = vcmp.ne.s32.totalorder %v509_v20, 0 }
 0x203   : > { %v493_v31 = vsel %vm477_vm3, %v469_v15, %v485_v23  ;;  %v486_v33 = vmul.f32 0.2, %v470_v24  ;;  %v471_v25 = vadd.f32 %v2223_v43, %v458_v28  ;;  %vm478_vm7 = vcmp.gt.f32.partialorder %v470_v24, 0.0 }
 0x204   : > { %v541_v37 = vsel %vm528_vm8, %v524_v29, -inf  ;;  %v525_v38 = vsel %vm2282_vm6, %v493_v31, -1e+09  ;;  %vm2291_vm10 = vcmp.ne.s32.totalorder %v510_v30, 0  ;;  %vm2298_vm13 = vcmp.ne.s32.totalorder %v511_v42, 0  ;;  %v1939_v31 = vld [vmem:[%s2506_s2 + $0x8] sm:$0xff]  }
 0x205   : > { %533 = vmax.xlane.f32.xlu0 %v532_v7  ;;  %v494_v39 = vsel %vm478_vm7, %v470_v24, %v486_v33  ;;  %v487_v41 = vmul.f32 0.2, %v471_v25  ;;  %vm479_vm11 = vcmp.gt.f32.partialorder %v471_v25, 0.0  ;;  %v544_v44 = vsel %vm528_vm8, %v525_v38, -inf  ;;  %1824 = vmatprep.subr.bf16.mxu0 %v1939_v31 }
 0x206   : > { %v526_v35 = vsel %vm2291_vm10, %v494_v39, -1e+09  ;;  %1825 = vmatpush3.bf16.msra.mxu0 %v1939_v31 }
 0x207   : > { %v495_v43 = vsel %vm479_vm11, %v471_v25, %v487_v41  ;;  %v547_v46 = vsel %vm528_vm8, %v526_v35, -inf }
 0x208   : > { %v527_v47 = vsel %vm2298_vm13, %v495_v43, -1e+09 }
 0x209   : > { %536 = vmax.xlane.f32.xlu0 %v535_v17  ;;  %v550_v48 = vsel %vm528_vm8, %v527_v47, -inf }
 0x20d   : > { %539 = vmax.xlane.f32.xlu0 %v538_v27 }
 0x211   : > { %542 = vmax.xlane.f32.xlu0 %v541_v37 }
 0x215   : > { %545 = vmax.xlane.f32.xlu0 %v544_v44 }
 0x219   : > { %548 = vmax.xlane.f32.xlu0 %v547_v46 }
 0x21d   : > { %551 = vmax.xlane.f32.xlu0 %v550_v48 }
 0x28e   : > { %v531_v49 = vpop.xlane.xlu0 %530 }
 0x28f   : > { %v553_v51 = vsub.f32 %v2242_v61, %v531_v49 }
 0x291   : > { %v561_v52 = vmul.f32 1.442695, %v553_v51 }
 0x292   : > { %v534_v53 = vpop.xlane.xlu0 %533 }
 0x293   : > { %1945 = vpow2.f32 %v561_v52  ;;  %v554_v54 = vsub.f32 %v2249_v0, %v534_v53 }
 0x295   : > { %v563_v56 = vmul.f32 1.442695, %v554_v54 }
 0x296   : > { %v537_v57 = vpop.xlane.xlu0 %536 }
 0x297   : > { %1947 = vpow2.f32 %v563_v56  ;;  %v555_v58 = vsub.f32 %v522_v10, %v537_v57 }
 0x299   : > { %v565_v59 = vmul.f32 1.442695, %v555_v58 }
 0x29a   : > { %v540_v60 = vpop.xlane.xlu0 %539 }
 0x29b   : > { %1949 = vpow2.f32 %v565_v59  ;;  %v556_v62 = vsub.f32 %v523_v18, %v540_v60 }
 0x29d   : > { %v1946_v63 = vpop.eup %1945  ;;  %v567_v1 = vmul.f32 1.442695, %v556_v62 }
 0x29e   : > { %v543_v2 = vpop.xlane.xlu0 %542  ;;  %v577_v3 = vsel %vm528_vm8, %v1946_v63, 0.0 }
 0x29f   : > { %1951 = vpow2.f32 %v567_v1  ;;  %v557_v61 = vsub.f32 %v524_v29, %v543_v2  ;;  %578 = vadd.xlane.f32.xlu0 %v577_v3  ;;  %v1940_v3 = vld [vmem:[%s2506_s2 + $0x10] sm:$0xff]  }
 0x2a0   : > { %1826 = vmatprep.subr.bf16.mxu0 %v1940_v3 }
 0x2a1   : > { %v1948_v5 = vpop.eup %1947  ;;  %v569_v6 = vmul.f32 1.442695, %v557_v61  ;;  %1827 = vmatpush3.bf16.msra.mxu0 %v1940_v3  ;;  %v1719_v61 = vld [vmem:[%s2507_s3] ss:$0 sm:$0xff] }
 0x2a2   : > { %v546_v7 = vpop.xlane.xlu0 %545  ;;  %v580_v0 = vsel %vm528_vm8, %v1948_v5, 0.0 }
 0x2a3   : > { %1953 = vpow2.f32 %v569_v6  ;;  %v558_v8 = vsub.f32 %v525_v38, %v546_v7  ;;  %581 = vadd.xlane.f32.xlu0 %v580_v0 }
 0x2a5   : > { %v1950_v9 = vpop.eup %1949  ;;  %v571_v10 = vmul.f32 1.442695, %v558_v8 }
 0x2a6   : > { %v549_v12 = vpop.xlane.xlu0 %548  ;;  %v583_v13 = vsel %vm528_vm8, %v1950_v9, 0.0 }
 0x2a7   : > { %1955 = vpow2.f32 %v571_v10  ;;  %v559_v14 = vsub.f32 %v526_v35, %v549_v12  ;;  %584 = vadd.xlane.f32.xlu1 %v583_v13 }
 0x2a9   : > { %v1952_v15 = vpop.eup %1951  ;;  %v573_v16 = vmul.f32 1.442695, %v559_v14 }
 0x2aa   : > { %v552_v17 = vpop.xlane.xlu0 %551  ;;  %v586_v18 = vsel %vm528_vm8, %v1952_v15, 0.0 }
 0x2ab   : > { %1957 = vpow2.f32 %v573_v16  ;;  %v560_v20 = vsub.f32 %v527_v47, %v552_v17  ;;  %587 = vadd.xlane.f32.xlu0 %v586_v18 }
 0x2ad   : > { %v1954_v21 = vpop.eup %1953  ;;  %v575_v22 = vmul.f32 1.442695, %v560_v20 }
 0x2ae   : > { %v589_v23 = vsel %vm528_vm8, %v1954_v21, 0.0 }
 0x2af   : > { %1959 = vpow2.f32 %v575_v22  ;;  %590 = vadd.xlane.f32.xlu0 %v589_v23 }
 0x2b1   : > { %v1956_v24 = vpop.eup %1955 }
 0x2b2   : > { %v592_v26 = vsel %vm528_vm8, %v1956_v24, 0.0 }
 0x2b3   : > { %593 = vadd.xlane.f32.xlu0 %v592_v26 }
 0x2b5   : > { %v1958_v27 = vpop.eup %1957 }
 0x2b6   : > { %v595_v28 = vsel %vm528_vm8, %v1958_v27, 0.0 }
 0x2b7   : > { %596 = vadd.xlane.f32.xlu0 %v595_v28 }
 0x2b9   : > { %v1960_v29 = vpop.eup %1959 }
 0x2ba   : > { %v598_v30 = vsel %vm528_vm8, %v1960_v29, 0.0 }
 0x2bb   : > { %599 = vadd.xlane.f32.xlu0 %v598_v30 }
 0x32c   : > { %v579_v33 = vpop.xlane.xlu0 %578 }
 0x32d   : > { %1961 = vrcp.f32 %v579_v33 }
 0x330   : > { %v582_v25 = vpop.xlane.xlu0 %581 }
 0x331   : > { %1963 = vrcp.f32 %v582_v25 }
 0x334   : > { %v585_v36 = vpop.xlane.xlu1 %584 }
 0x335   : > { %1965 = vrcp.f32 %v585_v36 }
 0x337   : > { %v1962_v38 = vpop.eup %1961 }
 0x338   : > { %v588_v37 = vpop.xlane.xlu0 %587  ;;  %v609_v42 = vmul.f32 %v1962_v38, %v1946_v63 }
 0x339   : > { %1967 = vrcp.f32 %v588_v37 }
 0x33b   : > { %v1964_v39 = vpop.eup %1963 }
 0x33c   : > { %v591_v41 = vpop.xlane.xlu0 %590  ;;  %v610_v44 = vmul.f32 %v1964_v39, %v1948_v5 }
 0x33d   : > { %1969 = vrcp.f32 %v591_v41 }
 0x33e   : > { %v617_v35 = vpack.c.bf16 %v610_v44, %v609_v42 }
 0x33f   : > { %v1966_v46 = vpop.eup %1965 }
 0x340   : > { %1816 = vmatprep.mubr.msk.bf16.mxu1 %vm528_vm8, %v617_v35  ;;  %v594_v43 = vpop.xlane.xlu0 %593  ;;  %v611_v49 = vmul.f32 %v1966_v46, %v1950_v9 }
 0x341   : > { %1971 = vrcp.f32 %v594_v43 }
 0x343   : > { %v1968_v47 = vpop.eup %1967 }
 0x344   : > { %v597_v48 = vpop.xlane.xlu0 %596  ;;  %v612_v51 = vmul.f32 %v1968_v47, %v1952_v15 }
 0x345   : > { %1973 = vrcp.f32 %v597_v48 }
 0x346   : > { %v618_v52 = vpack.c.bf16 %v612_v51, %v611_v49 }
 0x347   : > { %v1970_v54 = vpop.eup %1969 }
 0x348   : > { %v600_v53 = vpop.xlane.xlu0 %599  ;;  %1817 = vmatmul.mubr.msk.bf16.vlgmr.msra.gmra.mrb[0].mxu1 %vm528_vm8, %v618_v52  ;;  %v613_v57 = vmul.f32 %v1970_v54, %v1954_v21 }
 0x349   : > { %1975 = vrcp.f32 %v600_v53 }
 0x34b   : > { %v1972_v56 = vpop.eup %1971 }
 0x34c   : > { %v614_v58 = vmul.f32 %v1972_v56, %v1956_v24 }
 0x34e   : > { %v619_v59 = vpack.c.bf16 %v614_v58, %v613_v57 }
 0x34f   : > { %v1974_v60 = vpop.eup %1973 }
 0x350   : > { %1820 = vmatprep.mubr.msk.bf16.mxu1 %vm528_vm8, %v619_v59  ;;  %v615_v63 = vmul.f32 %v1974_v60, %v1958_v27 }
 0x353   : > { %v1976_v62 = vpop.eup %1975 }
 0x354   : > { %v616_v1 = vmul.f32 %v1976_v62, %v1960_v29 }
 0x356   : > { %v620_v2 = vpack.c.bf16 %v616_v1, %v615_v63 }
 0x358   : > { %1821 = vmatmul.mubr.msk.bf16.gmra.mrb[4].mxu1 %vm528_vm8, %v620_v2 }
 0x41b   : > { %v1818_v5 = vpop.f32.mrb[0].mxu1 }
 0x41c   : > { %v684_v6 = vadd.f32 %v1818_v5, %v1719_v61  ;;  %v675_v7 = vpop.f32.mrb[1].mxu1 }
 0x41d   : > { %v676_v0 = vadd.f32 %v1719_v61, %v675_v7  ;;  %v1819_v8 = vpop.f32.mrb[2].mxu1 }
 0x41e   : > { %v687_v9 = vadd.f32 %v1819_v8, %v1719_v61  ;;  %v678_v10 = vpop.f32.mrb[3].mxu1  ;;  %v708_v13 = vmax.f32 %v684_v6, 0.0 }
 0x41f   : > { %v679_v12 = vadd.f32 %v1719_v61, %v678_v10  ;;  %v706_v15 = vmax.f32 %v676_v0, 0.0 }
 0x420   : > { %v709_v14 = vmax.f32 %v687_v9, 0.0 }
 0x421   : > { %v707_v16 = vmax.f32 %v679_v12, 0.0 }
 0x422   : > { %v715_v17 = vpack.c.bf16 %v709_v14, %v708_v13 }
 0x423   : > { %v714_v18 = vpack.c.bf16 %v707_v16, %v706_v15 }
 0x425   : > { %1828 = vmatprep.mubr.msk.bf16.mxu0 %vm730_vm14, %v714_v18 }
 0x426   : > { %1829 = vmatmul.mubr.msk.bf16.vlgmr.msra.gmra.mrb[8].mxu0 %vm730_vm14, %v715_v17 }
 0x42b   : > { %v1822_v20 = vpop.f32.mrb[4].mxu1 }
 0x42c   : > { %v700_v21 = vadd.f32 %v1822_v20, %v1719_v61  ;;  %v691_v22 = vpop.f32.mrb[5].mxu1 }
 0x42d   : > { %v692_v23 = vadd.f32 %v1719_v61, %v691_v22  ;;  %v1823_v24 = vpop.f32.mrb[6].mxu1 }
 0x42e   : > { %v703_v26 = vadd.f32 %v1823_v24, %v1719_v61  ;;  %v694_v27 = vpop.f32.mrb[7].mxu1  ;;  %v712_v29 = vmax.f32 %v700_v21, 0.0 }
 0x42f   : > { %v695_v28 = vadd.f32 %v1719_v61, %v694_v27  ;;  %v710_v31 = vmax.f32 %v692_v23, 0.0 }
 0x430   : > { %v713_v30 = vmax.f32 %v703_v26, 0.0 }
 0x431   : > { %v711_v33 = vmax.f32 %v695_v28, 0.0 }
 0x432   : > { %v717_v25 = vpack.c.bf16 %v713_v30, %v712_v29 }
 0x433   : > { %v716_v36 = vpack.c.bf16 %v711_v33, %v710_v31 }
 0x435   : > { %1832 = vmatprep.mubr.msk.bf16.mxu0 %vm730_vm14, %v716_v36 }
 0x436   : > { %1833 = vmatmul.mubr.msk.bf16.gmra.mrb[12].mxu0 %vm730_vm14, %v717_v25 }
 0x4f9   : > { %v1830_v37 = vpop.f32.mrb[8].mxu0 }
 0x4fa   : > { %820 = vrot.lane.b32.xlu0 %v1830_v37, %s2106_s8  ;;  %v777_v38 = vpop.f32.mrb[9].mxu0 }
 0x4fb   : > { %v1831_v39 = vpop.f32.mrb[10].mxu0 }
 0x4fc   : > { %v1041_v41 = vpack.c.bf16 %v1831_v39, %v1830_v37  ;;  %v780_v42 = vpop.f32.mrb[11].mxu0 }
 0x4fd   : > { %v1040_v44 = vpack.c.bf16 %v780_v42, %v777_v38  ;;  %818 = vrot.lane.b32.xlu1 %v780_v42, %s2106_s8 }
 0x4fe   : > { %816 = vrot.lane.b32.xlu0 %v777_v38, %s2106_s8 }
 0x4ff   : > { %1836 = vmatprep.subr.bf16.mxu1 %v1040_v44 }
 0x500   : > { %1837 = vmatpush3.bf16.msra.mxu1 %v1040_v44 }
 0x501   : > { %1838 = vmatprep.subr.bf16.mxu1 %v1041_v41 }
 0x502   : > { %822 = vrot.lane.b32.xlu0 %v1831_v39, %s2106_s8 }
 0x504   : > { %1839 = vmatpush3.bf16.msra.mxu1 %v1041_v41 }
 0x509   : > { %v1834_v35 = vpop.f32.mrb[12].mxu0 }
 0x50a   : > { %828 = vrot.lane.b32.xlu1 %v1834_v35, %s2106_s8  ;;  %v793_v43 = vpop.f32.mrb[13].mxu0 }
 0x50b   : > { %824 = vrot.lane.b32.xlu0 %v793_v43, %s2106_s8  ;;  %v1835_v46 = vpop.f32.mrb[14].mxu0 }
 0x50c   : > { %v1043_v47 = vpack.c.bf16 %v1835_v46, %v1834_v35  ;;  %v796_v48 = vpop.f32.mrb[15].mxu0 }
 0x50d   : > { %v1042_v49 = vpack.c.bf16 %v796_v48, %v793_v43 }
 0x50e   : > { %873 = vperm.xlu1 %1933, %v777_v38  }
 0x50f   : > { %826 = vrot.lane.b32.xlu0 %v796_v48, %s2106_s8  ;;  %1840 = vmatprep.subr.bf16.mxu1 %v1042_v49 }
 0x510   : > { %1841 = vmatpush3.bf16.msra.mxu1 %v1042_v49 }
 0x511   : > { %1842 = vmatprep.subr.bf16.mxu1 %v1043_v47 }
 0x512   : > { %881 = vperm.xlu1 %1933, %v1830_v37  }
 0x513   : > { %830 = vrot.lane.b32.xlu0 %v1835_v46, %s2106_s8 }
 0x514   : > { %1843 = vmatpush3.bf16.msra.mxu1 %v1043_v47 }
 0x516   : > { %889 = vperm.xlu1 %1933, %v793_v43  }
 0x517   : > { %877 = vperm.xlu0 %1932, %v780_v42  }
 0x51a   : > { %897 = vperm.xlu1 %1933, %v1834_v35  }
 0x51b   : > { %885 = vperm.xlu0 %1932, %v1831_v39  }
 0x51f   : > { %893 = vperm.xlu0 %1932, %v796_v48  }
 0x523   : > { %901 = vperm.xlu0 %1932, %v1835_v46  }
 0x56c   : > { %v821_v51 = vpop.permute.xlu0 %820 }
 0x56f   : > { %v819_v53 = vpop.permute.xlu1 %818 }
 0x570   : > { %v817_v52 = vpop.permute.xlu0 %816 }
 0x571   : > { %840 = vxpose.xlu1.b32.start [1/8] (short) (narrow) %v817_v52, 8 }
 0x574   : > { %v823_v54 = vpop.permute.xlu0 %822 }
 0x575   : > { %841 = vxpose.xlu1.b32.cont [2/8] (short) (narrow) %v819_v53, 8 }
 0x579   : > { %842 = vxpose.xlu1.b32.cont [3/8] (short) (narrow) %v821_v51, 8 }
 0x57c   : > { %v829_v58 = vpop.permute.xlu1 %828 }
 0x57d   : > { %843 = vxpose.xlu1.b32.cont [4/8] (short) (narrow) %v823_v54, 8  ;;  %v825_v56 = vpop.permute.xlu0 %824 }
 0x581   : > { %844 = vxpose.xlu1.b32.cont [5/8] (short) (narrow) %v825_v56, 8  ;;  %v827_v57 = vpop.permute.xlu0 %826 }
 0x585   : > { %845 = vxpose.xlu1.b32.cont [6/8] (short) (narrow) %v827_v57, 8  ;;  %v831_v59 = vpop.permute.xlu0 %830 }
 0x589   : > { %846 = vxpose.xlu1.b32.cont [7/8] (short) (narrow) %v829_v58, 8 }
 0x58d   : > { %847 = vxpose.xlu1.b32.end [8/8] (short) (narrow) %v831_v59, 8  ;;  %v874_v60 = vpop.permute.xlu1 %873 }
 0x591   : > { %v882_v62 = vpop.permute.xlu1 %881 }
 0x595   : > { %v890_v63 = vpop.permute.xlu1 %889 }
 0x596   : > { %v878_v2 = vpop.permute.xlu0 %877 }
 0x599   : > { %v898_v1 = vpop.permute.xlu1 %897 }
 0x59a   : > { %v886_v9 = vpop.permute.xlu0 %885 }
 0x59e   : > { %v894_v23 = vpop.permute.xlu0 %893 }
 0x5a2   : > { %v902_v37 = vpop.permute.xlu0 %901 }
 0x5f1   : > { %v856_v3 = vpop.trf.xlu1 }
 0x5f2   : > { %v907_v61 = vrot.slane %v856_v3, %v2216_v34 }
 0x5f4   : > { %v908_v5 = vadd.f32 %v907_v61, %v874_v60  ;;  %v909_v6 = vadd.f32 %v907_v61, %v878_v2  ;;  %v910_v7 = vadd.f32 %v907_v61, %v882_v62  ;;  %v911_v14 = vadd.f32 %v907_v61, %v886_v9 }
 0x5f5   : > { %v912_v21 = vadd.f32 %v907_v61, %v890_v63  ;;  %v913_v28 = vadd.f32 %v907_v61, %v894_v23  ;;  %v914_v25 = vadd.f32 %v907_v61, %v898_v1  ;;  %v915_v42 = vadd.f32 %v907_v61, %v902_v37  ;;  %v1941_v37 = vld [vmem:[%s2506_s2 + $0x18] sm:$0xff]  }
 0x5f6   : > { %vm916_vm0 = vcmp.gt.f32.partialorder %v908_v5, 0.0  ;;  %v924_v0 = vmul.f32 0.2, %v908_v5  ;;  %vm917_vm1 = vcmp.gt.f32.partialorder %v909_v6, 0.0  ;;  %v925_v8 = vmul.f32 0.2, %v909_v6  ;;  %1852 = vmatprep.subr.bf16.mxu0 %v1941_v37 }
 0x5f7   : > { %v926_v13 = vmul.f32 0.2, %v910_v7  ;;  %vm918_vm3 = vcmp.gt.f32.partialorder %v910_v7, 0.0  ;;  %v927_v20 = vmul.f32 0.2, %v911_v14  ;;  %vm919_vm4 = vcmp.gt.f32.partialorder %v911_v14, 0.0  ;;  %1853 = vmatpush3.bf16.msra.mxu0 %v1941_v37 }
 0x5f8   : > { %v932_v10 = vsel %vm916_vm0, %v908_v5, %v924_v0  ;;  %v933_v12 = vsel %vm917_vm1, %v909_v6, %v925_v8  ;;  %v928_v27 = vmul.f32 0.2, %v912_v21  ;;  %vm920_vm7 = vcmp.gt.f32.partialorder %v912_v21, 0.0 }
 0x5f9   : > { %v940_v15 = vsel %vm2230_vm5, %v932_v10, -1e+09  ;;  %v941_v17 = vsel %vm2235_vm9, %v933_v12, -1e+09  ;;  %v934_v18 = vsel %vm918_vm3, %v910_v7, %v926_v13  ;;  %v935_v26 = vsel %vm919_vm4, %v911_v14, %v927_v20 }
 0x5fa   : > { %v948_v16 = vsel %vm528_vm8, %v940_v15, -inf  ;;  %v951_v22 = vsel %vm528_vm8, %v941_v17, -inf  ;;  %v942_v24 = vsel %vm2252_vm12, %v934_v18, -1e+09  ;;  %v943_v30 = vsel %vm2262_vm15, %v935_v26, -1e+09 }
 0x5fb   : > { %949 = vmax.xlane.f32.xlu0 %v948_v16  ;;  %v954_v29 = vsel %vm528_vm8, %v942_v24, -inf  ;;  %v936_v31 = vsel %vm920_vm7, %v912_v21, %v928_v27  ;;  %v929_v33 = vmul.f32 0.2, %v913_v28  ;;  %vm921_vm11 = vcmp.gt.f32.partialorder %v913_v28, 0.0 }
 0x5fc   : > { %v957_v36 = vsel %vm528_vm8, %v943_v30, -inf  ;;  %v944_v38 = vsel %vm2271_vm2, %v936_v31, -1e+09  ;;  %v930_v41 = vmul.f32 0.2, %v914_v25  ;;  %vm922_vm0 = vcmp.gt.f32.partialorder %v914_v25, 0.0 }
 0x5fd   : > { %v937_v39 = vsel %vm921_vm11, %v913_v28, %v929_v33  ;;  %v960_v44 = vsel %vm528_vm8, %v944_v38, -inf  ;;  %v931_v46 = vmul.f32 0.2, %v915_v42  ;;  %vm923_vm1 = vcmp.gt.f32.partialorder %v915_v42, 0.0 }
 0x5fe   : > { %v945_v35 = vsel %vm2282_vm6, %v937_v39, -1e+09  ;;  %v938_v43 = vsel %vm922_vm0, %v914_v25, %v930_v41 }
 0x5ff   : > { %952 = vmax.xlane.f32.xlu0 %v951_v22  ;;  %v963_v47 = vsel %vm528_vm8, %v945_v35, -inf  ;;  %v946_v48 = vsel %vm2291_vm10, %v938_v43, -1e+09  ;;  %v939_v49 = vsel %vm923_vm1, %v915_v42, %v931_v46 }
 0x600   : > { %v966_v51 = vsel %vm528_vm8, %v946_v48, -inf  ;;  %v947_v52 = vsel %vm2298_vm13, %v939_v49, -1e+09 }
 0x601   : > { %v969_v53 = vsel %vm528_vm8, %v947_v52, -inf }
 0x603   : > { %955 = vmax.xlane.f32.xlu0 %v954_v29 }
 0x607   : > { %958 = vmax.xlane.f32.xlu0 %v957_v36 }
 0x60b   : > { %961 = vmax.xlane.f32.xlu0 %v960_v44 }
 0x60f   : > { %964 = vmax.xlane.f32.xlu0 %v963_v47 }
 0x613   : > { %967 = vmax.xlane.f32.xlu0 %v966_v51 }
 0x617   : > { %970 = vmax.xlane.f32.xlu0 %v969_v53 }
 0x688   : > { %v950_v54 = vpop.xlane.xlu0 %949 }
 0x689   : > { %v972_v56 = vsub.f32 %v940_v15, %v950_v54 }
 0x68b   : > { %v980_v57 = vmul.f32 1.442695, %v972_v56 }
 0x68c   : > { %v953_v58 = vpop.xlane.xlu0 %952 }
 0x68d   : > { %1977 = vpow2.f32 %v980_v57  ;;  %v973_v59 = vsub.f32 %v941_v17, %v953_v58 }
 0x68f   : > { %v982_v60 = vmul.f32 1.442695, %v973_v59 }
 0x690   : > { %v956_v62 = vpop.xlane.xlu0 %955 }
 0x691   : > { %1979 = vpow2.f32 %v982_v60  ;;  %v974_v63 = vsub.f32 %v942_v24, %v956_v62 }
 0x693   : > { %v984_v1 = vmul.f32 1.442695, %v974_v63 }
 0x694   : > { %v959_v2 = vpop.xlane.xlu0 %958 }
 0x695   : > { %1981 = vpow2.f32 %v984_v1  ;;  %v975_v3 = vsub.f32 %v943_v30, %v959_v2 }
 0x697   : > { %v1978_v61 = vpop.eup %1977  ;;  %v986_v5 = vmul.f32 1.442695, %v975_v3 }
 0x698   : > { %v962_v6 = vpop.xlane.xlu0 %961  ;;  %v996_v7 = vsel %vm528_vm8, %v1978_v61, 0.0 }
 0x699   : > { %1983 = vpow2.f32 %v986_v5  ;;  %v976_v0 = vsub.f32 %v944_v38, %v962_v6  ;;  %997 = vadd.xlane.f32.xlu0 %v996_v7  ;;  %v1942_v7 = vld [vmem:[%s2506_s2 + $0x20] sm:$0xff]  }
 0x69a   : > { %1854 = vmatprep.subr.bf16.mxu0 %v1942_v7 }
 0x69b   : > { %v1980_v8 = vpop.eup %1979  ;;  %v988_v9 = vmul.f32 1.442695, %v976_v0  ;;  %1855 = vmatpush3.bf16.msra.mxu0 %v1942_v7  ;;  %v1730_v0 = vld [vmem:[%s2507_s3 + $0x1] ss:$0 sm:$0xff] }
 0x69c   : > { %v965_v10 = vpop.xlane.xlu0 %964  ;;  %v999_v12 = vsel %vm528_vm8, %v1980_v8, 0.0 }
 0x69d   : > { %1985 = vpow2.f32 %v988_v9  ;;  %v977_v13 = vsub.f32 %v945_v35, %v965_v10  ;;  %1000 = vadd.xlane.f32.xlu0 %v999_v12 }
 0x69f   : > { %v1982_v14 = vpop.eup %1981  ;;  %v990_v15 = vmul.f32 1.442695, %v977_v13 }
 0x6a0   : > { %v968_v16 = vpop.xlane.xlu0 %967  ;;  %v1002_v17 = vsel %vm528_vm8, %v1982_v14, 0.0 }
 0x6a1   : > { %1987 = vpow2.f32 %v990_v15  ;;  %v978_v18 = vsub.f32 %v946_v48, %v968_v16  ;;  %1003 = vadd.xlane.f32.xlu1 %v1002_v17 }
 0x6a3   : > { %v1984_v20 = vpop.eup %1983  ;;  %v992_v21 = vmul.f32 1.442695, %v978_v18 }
 0x6a4   : > { %v971_v22 = vpop.xlane.xlu0 %970  ;;  %v1005_v23 = vsel %vm528_vm8, %v1984_v20, 0.0 }
 0x6a5   : > { %1989 = vpow2.f32 %v992_v21  ;;  %v979_v24 = vsub.f32 %v947_v52, %v971_v22  ;;  %1006 = vadd.xlane.f32.xlu0 %v1005_v23 }
 0x6a7   : > { %v1986_v26 = vpop.eup %1985  ;;  %v994_v27 = vmul.f32 1.442695, %v979_v24 }
 0x6a8   : > { %v1008_v28 = vsel %vm528_vm8, %v1986_v26, 0.0 }
 0x6a9   : > { %1991 = vpow2.f32 %v994_v27  ;;  %1009 = vadd.xlane.f32.xlu0 %v1008_v28 }
 0x6ab   : > { %v1988_v29 = vpop.eup %1987 }
 0x6ac   : > { %v1011_v30 = vsel %vm528_vm8, %v1988_v29, 0.0 }
 0x6ad   : > { %1012 = vadd.xlane.f32.xlu0 %v1011_v30 }
 0x6af   : > { %v1990_v31 = vpop.eup %1989 }
 0x6b0   : > { %v1014_v33 = vsel %vm528_vm8, %v1990_v31, 0.0 }
 0x6b1   : > { %1015 = vadd.xlane.f32.xlu0 %v1014_v33 }
 0x6b3   : > { %v1992_v25 = vpop.eup %1991 }
 0x6b4   : > { %v1017_v36 = vsel %vm528_vm8, %v1992_v25, 0.0 }
 0x6b5   : > { %1018 = vadd.xlane.f32.xlu0 %v1017_v36 }
 0x726   : > { %v998_v38 = vpop.xlane.xlu0 %997 }
 0x727   : > { %1993 = vrcp.f32 %v998_v38 }
 0x72a   : > { %v1001_v39 = vpop.xlane.xlu0 %1000 }
 0x72b   : > { %1995 = vrcp.f32 %v1001_v39 }
 0x72e   : > { %v1004_v41 = vpop.xlane.xlu1 %1003 }
 0x72f   : > { %1997 = vrcp.f32 %v1004_v41 }
 0x731   : > { %v1994_v44 = vpop.eup %1993 }
 0x732   : > { %v1007_v42 = vpop.xlane.xlu0 %1006  ;;  %v1028_v46 = vmul.f32 %v1994_v44, %v1978_v61 }
 0x733   : > { %1999 = vrcp.f32 %v1007_v42 }
 0x735   : > { %v1996_v35 = vpop.eup %1995 }
 0x736   : > { %v1010_v43 = vpop.xlane.xlu0 %1009  ;;  %v1029_v47 = vmul.f32 %v1996_v35, %v1980_v8 }
 0x737   : > { %2001 = vrcp.f32 %v1010_v43 }
 0x738   : > { %v1036_v48 = vpack.c.bf16 %v1029_v47, %v1028_v46 }
 0x739   : > { %v1998_v51 = vpop.eup %1997 }
 0x73a   : > { %1844 = vmatprep.mubr.msk.bf16.mxu1 %vm528_vm8, %v1036_v48  ;;  %v1013_v49 = vpop.xlane.xlu0 %1012  ;;  %v1030_v53 = vmul.f32 %v1998_v51, %v1982_v14 }
 0x73b   : > { %2003 = vrcp.f32 %v1013_v49 }
 0x73d   : > { %v2000_v52 = vpop.eup %1999 }
 0x73e   : > { %v1031_v54 = vmul.f32 %v2000_v52, %v1984_v20  ;;  %v1016_v56 = vpop.xlane.xlu0 %1015 }
 0x73f   : > { %2005 = vrcp.f32 %v1016_v56 }
 0x740   : > { %v1037_v57 = vpack.c.bf16 %v1031_v54, %v1030_v53 }
 0x741   : > { %v2002_v59 = vpop.eup %2001 }
 0x742   : > { %v1019_v58 = vpop.xlane.xlu0 %1018  ;;  %1845 = vmatmul.mubr.msk.bf16.vlgmr.msra.gmra.mrb[8].mxu1 %vm528_vm8, %v1037_v57  ;;  %v1032_v62 = vmul.f32 %v2002_v59, %v1986_v26 }
 0x743   : > { %2007 = vrcp.f32 %v1019_v58 }
 0x745   : > { %v2004_v60 = vpop.eup %2003 }
 0x746   : > { %v1033_v63 = vmul.f32 %v2004_v60, %v1988_v29 }
 0x748   : > { %v1038_v1 = vpack.c.bf16 %v1033_v63, %v1032_v62 }
 0x749   : > { %v2006_v2 = vpop.eup %2005 }
 0x74a   : > { %1848 = vmatprep.mubr.msk.bf16.mxu1 %vm528_vm8, %v1038_v1  ;;  %v1034_v61 = vmul.f32 %v2006_v2, %v1990_v31 }
 0x74d   : > { %v2008_v3 = vpop.eup %2007 }
 0x74e   : > { %v1035_v5 = vmul.f32 %v2008_v3, %v1992_v25 }
 0x750   : > { %v1039_v6 = vpack.c.bf16 %v1035_v5, %v1034_v61 }
 0x752   : > { %1849 = vmatmul.mubr.msk.bf16.gmra.mrb[12].mxu1 %vm528_vm8, %v1039_v6 }
 0x815   : > { %v1846_v8 = vpop.f32.mrb[8].mxu1 }
 0x816   : > { %v1103_v9 = vadd.f32 %v1846_v8, %v1730_v0  ;;  %v1094_v10 = vpop.f32.mrb[9].mxu1 }
 0x817   : > { %v1095_v12 = vadd.f32 %v1730_v0, %v1094_v10  ;;  %v1847_v13 = vpop.f32.mrb[10].mxu1 }
 0x818   : > { %v1106_v14 = vadd.f32 %v1847_v13, %v1730_v0  ;;  %v1097_v15 = vpop.f32.mrb[11].mxu1  ;;  %v1127_v17 = vmax.f32 %v1103_v9, 0.0 }
 0x819   : > { %v1098_v16 = vadd.f32 %v1730_v0, %v1097_v15  ;;  %v1125_v20 = vmax.f32 %v1095_v12, 0.0 }
 0x81a   : > { %v1128_v18 = vmax.f32 %v1106_v14, 0.0 }
 0x81b   : > { %v1126_v21 = vmax.f32 %v1098_v16, 0.0 }
 0x81c   : > { %v1134_v22 = vpack.c.bf16 %v1128_v18, %v1127_v17 }
 0x81d   : > { %v1133_v23 = vpack.c.bf16 %v1126_v21, %v1125_v20 }
 0x81f   : > { %1856 = vmatprep.mubr.msk.bf16.mxu0 %vm730_vm14, %v1133_v23 }
 0x820   : > { %1857 = vmatmul.mubr.msk.bf16.vlgmr.msra.gmra.mrb[16].mxu0 %vm730_vm14, %v1134_v22 }
 0x825   : > { %v1850_v24 = vpop.f32.mrb[12].mxu1 }
 0x826   : > { %v1119_v26 = vadd.f32 %v1850_v24, %v1730_v0  ;;  %v1110_v27 = vpop.f32.mrb[13].mxu1 }
 0x827   : > { %v1111_v28 = vadd.f32 %v1730_v0, %v1110_v27  ;;  %v1851_v29 = vpop.f32.mrb[14].mxu1 }
 0x828   : > { %v1122_v30 = vadd.f32 %v1851_v29, %v1730_v0  ;;  %v1113_v31 = vpop.f32.mrb[15].mxu1  ;;  %v1131_v25 = vmax.f32 %v1119_v26, 0.0 }
 0x829   : > { %v1114_v33 = vadd.f32 %v1730_v0, %v1113_v31  ;;  %v1129_v37 = vmax.f32 %v1111_v28, 0.0 }
 0x82a   : > { %v1132_v36 = vmax.f32 %v1122_v30, 0.0 }
 0x82b   : > { %v1130_v38 = vmax.f32 %v1114_v33, 0.0 }
 0x82c   : > { %v1136_v39 = vpack.c.bf16 %v1132_v36, %v1131_v25 }
 0x82d   : > { %v1135_v41 = vpack.c.bf16 %v1130_v38, %v1129_v37 }
 0x82f   : > { %1860 = vmatprep.mubr.msk.bf16.mxu0 %vm730_vm14, %v1135_v41 }
 0x830   : > { %1861 = vmatmul.mubr.msk.bf16.gmra.mrb[20].mxu0 %vm730_vm14, %v1136_v39 }
 0x8f3   : > { %v1858_v42 = vpop.f32.mrb[16].mxu0 }
 0x8f4   : > { %1238 = vrot.lane.b32.xlu0 %v1858_v42, %s2106_s8  ;;  %v1195_v44 = vpop.f32.mrb[17].mxu0 }
 0x8f5   : > { %v1859_v35 = vpop.f32.mrb[18].mxu0 }
 0x8f6   : > { %v1459_v43 = vpack.c.bf16 %v1859_v35, %v1858_v42  ;;  %v1198_v46 = vpop.f32.mrb[19].mxu0 }
 0x8f7   : > { %v1458_v47 = vpack.c.bf16 %v1198_v46, %v1195_v44  ;;  %1236 = vrot.lane.b32.xlu1 %v1198_v46, %s2106_s8 }
 0x8f8   : > { %1234 = vrot.lane.b32.xlu0 %v1195_v44, %s2106_s8 }
 0x8f9   : > { %1864 = vmatprep.subr.bf16.mxu1 %v1458_v47 }
 0x8fa   : > { %1865 = vmatpush3.bf16.msra.mxu1 %v1458_v47 }
 0x8fb   : > { %1866 = vmatprep.subr.bf16.mxu1 %v1459_v43 }
 0x8fc   : > { %1240 = vrot.lane.b32.xlu0 %v1859_v35, %s2106_s8 }
 0x8fe   : > { %1867 = vmatpush3.bf16.msra.mxu1 %v1459_v43 }
 0x903   : > { %v1862_v48 = vpop.f32.mrb[20].mxu0 }
 0x904   : > { %1246 = vrot.lane.b32.xlu1 %v1862_v48, %s2106_s8  ;;  %v1211_v49 = vpop.f32.mrb[21].mxu0 }
 0x905   : > { %1242 = vrot.lane.b32.xlu0 %v1211_v49, %s2106_s8  ;;  %v1863_v51 = vpop.f32.mrb[22].mxu0 }
 0x906   : > { %v1461_v52 = vpack.c.bf16 %v1863_v51, %v1862_v48  ;;  %v1214_v53 = vpop.f32.mrb[23].mxu0 }
 0x907   : > { %v1460_v54 = vpack.c.bf16 %v1214_v53, %v1211_v49 }
 0x908   : > { %1291 = vperm.xlu1 %1933, %v1195_v44  }
 0x909   : > { %1244 = vrot.lane.b32.xlu0 %v1214_v53, %s2106_s8  ;;  %1868 = vmatprep.subr.bf16.mxu1 %v1460_v54 }
 0x90a   : > { %1869 = vmatpush3.bf16.msra.mxu1 %v1460_v54 }
 0x90b   : > { %1870 = vmatprep.subr.bf16.mxu1 %v1461_v52 }
 0x90c   : > { %1299 = vperm.xlu1 %1933, %v1858_v42  }
 0x90d   : > { %1248 = vrot.lane.b32.xlu0 %v1863_v51, %s2106_s8  ;;  %s2047_s8 = scalar_lea.vmem %s2046_s7, 32 }
 0x90e   : > { %1871 = vmatpush3.bf16.msra.mxu1 %v1461_v52  ;;  %p2049_p1 = scmp.lt.s32.totalorder %s2047_s8, %s2041_s5 }
 0x910   : > { %1307 = vperm.xlu1 %1933, %v1211_v49   ;;  %p2050_p2 = por %p2049_p1, %p2048_p0 }
 0x911   : > { %1295 = vperm.xlu0 %1932, %v1198_v46  }
 0x912   : > { %p2051_p3 = pnand %p2050_p2, %p2044_p13 }
 0x914   : > { %1315 = vperm.xlu1 %1933, %v1862_v48  }
 0x915   : > { %1303 = vperm.xlu0 %1932, %v1859_v35  }
 0x919   : > { %1311 = vperm.xlu0 %1932, %v1214_v53  }
 0x91d   : > { %1319 = vperm.xlu0 %1932, %v1863_v51  }
 0x966   : > { %v1239_v56 = vpop.permute.xlu0 %1238 }
 0x969   : > { %v1237_v58 = vpop.permute.xlu1 %1236 }
 0x96a   : > { %v1235_v57 = vpop.permute.xlu0 %1234 }
 0x96b   : > { %1258 = vxpose.xlu1.b32.start [1/8] (short) (narrow) %v1235_v57, 8 }
 0x96e   : > { %v1241_v59 = vpop.permute.xlu0 %1240 }
 0x96f   : > { %1259 = vxpose.xlu1.b32.cont [2/8] (short) (narrow) %v1237_v58, 8 }
 0x973   : > { %1260 = vxpose.xlu1.b32.cont [3/8] (short) (narrow) %v1239_v56, 8 }
 0x976   : > { %v1247_v63 = vpop.permute.xlu1 %1246 }
 0x977   : > { %1261 = vxpose.xlu1.b32.cont [4/8] (short) (narrow) %v1241_v59, 8  ;;  %v1243_v60 = vpop.permute.xlu0 %1242 }
 0x97b   : > { %1262 = vxpose.xlu1.b32.cont [5/8] (short) (narrow) %v1243_v60, 8  ;;  %v1245_v62 = vpop.permute.xlu0 %1244 }
 0x97f   : > { %1263 = vxpose.xlu1.b32.cont [6/8] (short) (narrow) %v1245_v62, 8  ;;  %v1249_v1 = vpop.permute.xlu0 %1248 }
 0x983   : > { %1264 = vxpose.xlu1.b32.cont [7/8] (short) (narrow) %v1247_v63, 8 }
 0x987   : > { %1265 = vxpose.xlu1.b32.end [8/8] (short) (narrow) %v1249_v1, 8  ;;  %v1292_v2 = vpop.permute.xlu1 %1291 }
 0x98b   : > { %v1300_v3 = vpop.permute.xlu1 %1299 }
 0x98f   : > { %v1308_v61 = vpop.permute.xlu1 %1307 }
 0x990   : > { %v1296_v6 = vpop.permute.xlu0 %1295 }
 0x993   : > { %v1316_v5 = vpop.permute.xlu1 %1315 }
 0x994   : > { %v1304_v14 = vpop.permute.xlu0 %1303 }
 0x998   : > { %v1312_v27 = vpop.permute.xlu0 %1311 }
 0x99c   : > { %v1320_v38 = vpop.permute.xlu0 %1319 }
 0x9eb   : > { %v1274_v7 = vpop.trf.xlu1 }
 0x9ec   : > { %v1325_v0 = vrot.slane %v1274_v7, %v2216_v34 }
 0x9ee   : > { %v1326_v8 = vadd.f32 %v1325_v0, %v1292_v2  ;;  %v1327_v9 = vadd.f32 %v1325_v0, %v1296_v6  ;;  %v1328_v10 = vadd.f32 %v1325_v0, %v1300_v3  ;;  %v1329_v18 = vadd.f32 %v1325_v0, %v1304_v14 }
 0x9ef   : > { %v1330_v24 = vadd.f32 %v1325_v0, %v1308_v61  ;;  %v1331_v30 = vadd.f32 %v1325_v0, %v1312_v27  ;;  %v1332_v36 = vadd.f32 %v1325_v0, %v1316_v5  ;;  %v1333_v42 = vadd.f32 %v1325_v0, %v1320_v38 }
 0x9f0   : > { %vm1334_vm3 = vcmp.gt.f32.partialorder %v1326_v8, 0.0  ;;  %v1342_v12 = vmul.f32 0.2, %v1326_v8  ;;  %vm1335_vm4 = vcmp.gt.f32.partialorder %v1327_v9, 0.0  ;;  %v1343_v13 = vmul.f32 0.2, %v1327_v9 }
 0x9f1   : > { %v1344_v17 = vmul.f32 0.2, %v1328_v10  ;;  %vm1336_vm7 = vcmp.gt.f32.partialorder %v1328_v10, 0.0  ;;  %v1345_v23 = vmul.f32 0.2, %v1329_v18  ;;  %vm1337_vm11 = vcmp.gt.f32.partialorder %v1329_v18, 0.0 }
 0x9f2   : > { %v1350_v15 = vsel %vm1334_vm3, %v1326_v8, %v1342_v12  ;;  %v1351_v16 = vsel %vm1335_vm4, %v1327_v9, %v1343_v13  ;;  %v1346_v29 = vmul.f32 0.2, %v1330_v24  ;;  %v1347_v25 = vmul.f32 0.2, %v1331_v30 }
 0x9f3   : > { %v1358_v20 = vsel %vm2230_vm5, %v1350_v15, -1e+09  ;;  %v1359_v34 = vsel %vm2235_vm9, %v1351_v16, -1e+09  ;;  %v1352_v22 = vsel %vm1336_vm7, %v1328_v10, %v1344_v17  ;;  %v1353_v50 = vsel %vm1337_vm11, %v1329_v18, %v1345_v23 }
 0x9f4   : > { %v1366_v21 = vsel %vm528_vm8, %v1358_v20, -inf  ;;  %v1369_v26 = vsel %vm528_vm8, %v1359_v34, -inf  ;;  %v1360_v28 = vsel %vm2252_vm12, %v1352_v22, -1e+09  ;;  %vm1338_vm5 = vcmp.gt.f32.partialorder %v1330_v24, 0.0 }
 0x9f5   : > { %1367 = vmax.xlane.f32.xlu0 %v1366_v21  ;;  %v1372_v31 = vsel %vm528_vm8, %v1360_v28, -inf  ;;  %v1361_v55 = vsel %vm2262_vm15, %v1353_v50, -1e+09  ;;  %v1354_v33 = vsel %vm1338_vm5, %v1330_v24, %v1346_v29  ;;  %vm1339_vm9 = vcmp.gt.f32.partialorder %v1331_v30, 0.0 }
 0x9f6   : > { %v1375_v37 = vsel %vm528_vm8, %v1361_v55, -inf  ;;  %v1362_v4 = vsel %vm2271_vm2, %v1354_v33, -1e+09  ;;  %v1355_v39 = vsel %vm1339_vm9, %v1331_v30, %v1347_v25  ;;  %v1348_v41 = vmul.f32 0.2, %v1332_v36 }
 0x9f7   : > { %vm1340_vm12 = vcmp.gt.f32.partialorder %v1332_v36, 0.0  ;;  %v1378_v44 = vsel %vm528_vm8, %v1362_v4, -inf  ;;  %v1363_v11 = vsel %vm2282_vm6, %v1355_v39, -1e+09  ;;  %v1349_v43 = vmul.f32 0.2, %v1333_v42 }
 0x9f8   : > { %v1356_v35 = vsel %vm1340_vm12, %v1332_v36, %v1348_v41  ;;  %vm1341_vm15 = vcmp.gt.f32.partialorder %v1333_v42, 0.0  ;;  %v1381_v46 = vsel %vm528_vm8, %v1363_v11, -inf  ;;  %vm2109_vm2 = vmmov 0  }
 0x9f9   : > { %1370 = vmax.xlane.f32.xlu0 %v1369_v26  ;;  %v1364_v19 = vsel %vm2291_vm10, %v1356_v35, -1e+09  ;;  %v1357_v47 = vsel %vm1341_vm15, %v1333_v42, %v1349_v43 }
 0x9fa   : > { %v1384_v48 = vsel %vm528_vm8, %v1364_v19, -inf  ;;  %v1365_v49 = vsel %vm2298_vm13, %v1357_v47, -1e+09 }
 0x9fb   : > { %v1387_v51 = vsel %vm528_vm8, %v1365_v49, -inf }
 0x9fd   : > { %1373 = vmax.xlane.f32.xlu0 %v1372_v31 }
 0xa01   : > { %1376 = vmax.xlane.f32.xlu0 %v1375_v37 }
 0xa05   : > { %1379 = vmax.xlane.f32.xlu0 %v1378_v44 }
 0xa09   : > { %1382 = vmax.xlane.f32.xlu0 %v1381_v46 }
 0xa0d   : > { %1385 = vmax.xlane.f32.xlu0 %v1384_v48 }
 0xa11   : > { %1388 = vmax.xlane.f32.xlu0 %v1387_v51 }
 0xa82   : > { %v1368_v32 = vpop.xlane.xlu0 %1367 }
 0xa83   : > { %v1390_v52 = vsub.f32 %v1358_v20, %v1368_v32 }
 0xa85   : > { %v1398_v53 = vmul.f32 1.442695, %v1390_v52 }
 0xa86   : > { %v1371_v54 = vpop.xlane.xlu0 %1370 }
 0xa87   : > { %2009 = vpow2.f32 %v1398_v53  ;;  %v1391_v56 = vsub.f32 %v1359_v34, %v1371_v54 }
 0xa89   : > { %v1400_v57 = vmul.f32 1.442695, %v1391_v56  ;;  %v1943_v56 = vld [vmem:[%s2506_s2 + $0x28] sm:$0xff]  }
 0xa8a   : > { %v1374_v58 = vpop.xlane.xlu0 %1373 }
 0xa8b   : > { %2011 = vpow2.f32 %v1400_v57  ;;  %v1392_v40 = vsub.f32 %v1360_v28, %v1374_v58  ;;  %v2108_v57 = vmov 0.0   ;;  %v1944_v58 = vld [vmem:[%s2506_s2 + $0x30] sm:$0xff]  }
 0xa8c   : > { %1880 = vmatprep.subr.bf16.mxu0 %v2108_v57  ;;  %1884 = vmatprep.mubr.msk.bf16.mxu0 %vm2109_vm2, %v2108_v57 }
 0xa8d   : > { %v1402_v59 = vmul.f32 1.442695, %v1392_v40  ;;  %1881 = vmatpush3.bf16.msra.mxu0 %v1943_v56 }
 0xa8e   : > { %v1377_v60 = vpop.xlane.xlu0 %1376  ;;  %1882 = vmatprep.subr.bf16.mxu0 %v2108_v57 }
 0xa8f   : > { %2013 = vpow2.f32 %v1402_v59  ;;  %v1393_v62 = vsub.f32 %v1361_v55, %v1377_v60 }
 0xa91   : > { %v2010_v63 = vpop.eup %2009  ;;  %v1404_v45 = vmul.f32 1.442695, %v1393_v62  ;;  %1883 = vmatpush3.bf16.msra.mxu0 %v1944_v58 }
 0xa92   : > { %v1380_v1 = vpop.xlane.xlu0 %1379  ;;  %v1414_v2 = vsel %vm528_vm8, %v2010_v63, 0.0 }
 0xa93   : > { %2015 = vpow2.f32 %v1404_v45  ;;  %v1394_v3 = vsub.f32 %v1362_v4, %v1380_v1  ;;  %1415 = vadd.xlane.f32.xlu0 %v1414_v2 }
 0xa95   : > { %v2012_v61 = vpop.eup %2011  ;;  %v1406_v5 = vmul.f32 1.442695, %v1394_v3 }
 0xa96   : > { %v1383_v6 = vpop.xlane.xlu0 %1382  ;;  %v1417_v7 = vsel %vm528_vm8, %v2012_v61, 0.0 }
 0xa97   : > { %2017 = vpow2.f32 %v1406_v5  ;;  %v1395_v0 = vsub.f32 %v1363_v11, %v1383_v6  ;;  %1418 = vadd.xlane.f32.xlu0 %v1417_v7 }
 0xa99   : > { %v2014_v8 = vpop.eup %2013  ;;  %v1408_v9 = vmul.f32 1.442695, %v1395_v0 }
 0xa9a   : > { %v1386_v10 = vpop.xlane.xlu0 %1385  ;;  %v1420_v12 = vsel %vm528_vm8, %v2014_v8, 0.0 }
 0xa9b   : > { %2019 = vpow2.f32 %v1408_v9  ;;  %v1396_v13 = vsub.f32 %v1364_v19, %v1386_v10  ;;  %1421 = vadd.xlane.f32.xlu1 %v1420_v12 }
 0xa9d   : > { %v2016_v14 = vpop.eup %2015  ;;  %v1410_v15 = vmul.f32 1.442695, %v1396_v13 }
 0xa9e   : > { %v1389_v16 = vpop.xlane.xlu0 %1388  ;;  %v1423_v17 = vsel %vm528_vm8, %v2016_v14, 0.0 }
 0xa9f   : > { %2021 = vpow2.f32 %v1410_v15  ;;  %v1397_v18 = vsub.f32 %v1365_v49, %v1389_v16  ;;  %1424 = vadd.xlane.f32.xlu0 %v1423_v17 }
 0xaa1   : > { %v2018_v20 = vpop.eup %2017  ;;  %v1412_v21 = vmul.f32 1.442695, %v1397_v18 }
 0xaa2   : > { %v1426_v34 = vsel %vm528_vm8, %v2018_v20, 0.0 }
 0xaa3   : > { %2023 = vpow2.f32 %v1412_v21  ;;  %1427 = vadd.xlane.f32.xlu0 %v1426_v34 }
 0xaa5   : > { %v2020_v22 = vpop.eup %2019 }
 0xaa6   : > { %v1429_v23 = vsel %vm528_vm8, %v2020_v22, 0.0 }
 0xaa7   : > { %1430 = vadd.xlane.f32.xlu0 %v1429_v23 }
 0xaa9   : > { %v2022_v24 = vpop.eup %2021 }
 0xaaa   : > { %v1432_v26 = vsel %vm528_vm8, %v2022_v24, 0.0 }
 0xaab   : > { %1433 = vadd.xlane.f32.xlu0 %v1432_v26 }
 0xaad   : > { %v2024_v27 = vpop.eup %2023 }
 0xaae   : > { %v1435_v28 = vsel %vm528_vm8, %v2024_v27, 0.0 }
 0xaaf   : > { %1436 = vadd.xlane.f32.xlu0 %v1435_v28 }
 0xb20   : > { %v1416_v50 = vpop.xlane.xlu0 %1415 }
 0xb21   : > { %2025 = vrcp.f32 %v1416_v50 }
 0xb24   : > { %v1419_v29 = vpop.xlane.xlu0 %1418 }
 0xb25   : > { %2027 = vrcp.f32 %v1419_v29 }
 0xb28   : > { %v1422_v30 = vpop.xlane.xlu1 %1421 }
 0xb29   : > { %2029 = vrcp.f32 %v1422_v30 }
 0xb2b   : > { %v2026_v55 = vpop.eup %2025 }
 0xb2c   : > { %v1425_v31 = vpop.xlane.xlu0 %1424  ;;  %v1446_v36 = vmul.f32 %v2026_v55, %v2010_v63  ;;  %v1741_v63 = vld [vmem:[%s2507_s3 + $0x2] ss:$0 sm:$0xff] }
 0xb2d   : > { %2031 = vrcp.f32 %v1425_v31 }
 0xb2f   : > { %v2028_v33 = vpop.eup %2027 }
 0xb30   : > { %v1428_v25 = vpop.xlane.xlu0 %1427  ;;  %v1447_v37 = vmul.f32 %v2028_v33, %v2012_v61 }
 0xb31   : > { %2033 = vrcp.f32 %v1428_v25  ;;  %v259_v25 = vld [vmem:[%s2507_s3 + $0x3] sm:$0x1] }
 0xb32   : > { %v1454_v38 = vpack.c.bf16 %v1447_v37, %v1446_v36 }
 0xb33   : > { %v2030_v39 = vpop.eup %2029 }
 0xb34   : > { %1872 = vmatprep.mubr.msk.bf16.mxu1 %vm528_vm8, %v1454_v38  ;;  %v1431_v4 = vpop.xlane.xlu0 %1430  ;;  %v1448_v42 = vmul.f32 %v2030_v39, %v2014_v8 }
 0xb35   : > { %2035 = vrcp.f32 %v1431_v4 }
 0xb37   : > { %v2032_v41 = vpop.eup %2031 }
 0xb38   : > { %v1449_v44 = vmul.f32 %v2032_v41, %v2016_v14  ;;  %v1434_v11 = vpop.xlane.xlu0 %1433 }
 0xb39   : > { %2037 = vrcp.f32 %v1434_v11 }
 0xb3a   : > { %v1455_v35 = vpack.c.bf16 %v1449_v44, %v1448_v42 }
 0xb3b   : > { %v2034_v46 = vpop.eup %2033 }
 0xb3c   : > { %v1437_v43 = vpop.xlane.xlu0 %1436  ;;  %1873 = vmatmul.mubr.msk.bf16.vlgmr.msra.gmra.mrb[16].mxu1 %vm528_vm8, %v1455_v35  ;;  %v1450_v47 = vmul.f32 %v2034_v46, %v2018_v20 }
 0xb3d   : > { %2039 = vrcp.f32 %v1437_v43 }
 0xb3f   : > { %v2036_v19 = vpop.eup %2035 }
 0xb40   : > { %v1451_v48 = vmul.f32 %v2036_v19, %v2020_v22 }
 0xb42   : > { %v1456_v49 = vpack.c.bf16 %v1451_v48, %v1450_v47 }
 0xb43   : > { %v2038_v51 = vpop.eup %2037 }
 0xb44   : > { %1876 = vmatprep.mubr.msk.bf16.mxu1 %vm528_vm8, %v1456_v49  ;;  %v1452_v52 = vmul.f32 %v2038_v51, %v2022_v24 }
 0xb47   : > { %v2040_v32 = vpop.eup %2039 }
 0xb48   : > { %v1453_v53 = vmul.f32 %v2040_v32, %v2024_v27 }
 0xb4a   : > { %v1457_v54 = vpack.c.bf16 %v1453_v53, %v1452_v52 }
 0xb4c   : > { %1877 = vmatmul.mubr.msk.bf16.gmra.mrb[20].mxu1 %vm528_vm8, %v1457_v54  ;;  %vm1620_vm8 = vcmask 57344  }
 0xc0f   : > { %v1874_v40 = vpop.f32.mrb[16].mxu1 }
 0xc10   : > { %v1512_v59 = vpop.f32.mrb[17].mxu1  ;;  %v1521_v45 = vadd.f32 %v1874_v40, %v1741_v63 }
 0xc11   : > { %v1875_v60 = vpop.f32.mrb[18].mxu1  ;;  %v1513_v1 = vadd.f32 %v1741_v63, %v1512_v59 }
 0xc12   : > { %v1515_v62 = vpop.f32.mrb[19].mxu1  ;;  %v1524_v3 = vadd.f32 %v1875_v60, %v1741_v63  ;;  %v1545_v8 = vsel %vm730_vm14, %v1521_v45, -inf }
 0xc13   : > { %v1516_v6 = vadd.f32 %v1741_v63, %v1515_v62  ;;  %v1543_v13 = vsel %vm730_vm14, %v1513_v1, -inf }
 0xc14   : > { %v1546_v17 = vsel %vm730_vm14, %v1524_v3, -inf }
 0xc15   : > { %v1544_v21 = vsel %vm730_vm14, %v1516_v6, -inf }
 0xc1f   : > { %v1878_v2 = vpop.f32.mrb[20].mxu1 }
 0xc20   : > { %v1537_v61 = vadd.f32 %v1878_v2, %v1741_v63  ;;  %v1528_v5 = vpop.f32.mrb[21].mxu1 }
 0xc21   : > { %v1529_v7 = vadd.f32 %v1741_v63, %v1528_v5  ;;  %v1879_v0 = vpop.f32.mrb[22].mxu1 }
 0xc22   : > { %v1551_v9 = vsel %vm730_vm14, %v1537_v61, -inf  ;;  %v1540_v10 = vadd.f32 %v1879_v0, %v1741_v63  ;;  %v1531_v12 = vpop.f32.mrb[23].mxu1 }
 0xc23   : > { %v1552_v14 = vmax.f32 %v1545_v8, %v1551_v9  ;;  %v1547_v15 = vsel %vm730_vm14, %v1529_v7, -inf  ;;  %v1532_v16 = vadd.f32 %v1741_v63, %v1531_v12 }
 0xc24   : > { %v1548_v18 = vmax.f32 %v1543_v13, %v1547_v15  ;;  %v1553_v20 = vsel %vm730_vm14, %v1540_v10, -inf }
 0xc25   : > { %v1554_v34 = vmax.f32 %v1546_v17, %v1553_v20  ;;  %v1549_v22 = vsel %vm730_vm14, %v1532_v16, -inf }
 0xc26   : > { %v1550_v23 = vmax.f32 %v1544_v21, %v1549_v22 }
 0xc27   : > { %v1556_v24 = vmax.f32 %v1552_v14, %v1554_v34 }
 0xc28   : > { %v1555_v26 = vmax.f32 %v1548_v18, %v1550_v23 }
 0xc2a   : > { %v1557_v27 = vmax.f32 %v1555_v26, %v1556_v24 }
 0xc2c   : > { %v1558_v28 = vrot.slane %v1557_v27, 4 }
 0xc2e   : > { %v1559_v50 = vmax.f32 %v1557_v27, %v1558_v28 }
 0xc30   : > { %v1560_v29 = vrot.slane %v1559_v50, 2 }
 0xc32   : > { %v1561_v30 = vmax.f32 %v1559_v50, %v1560_v29 }
 0xc34   : > { %v1562_v31 = vrot.slane %v1561_v30, 1 }
 0xc36   : > { %v1563_v55 = vmax.f32 %v1561_v30, %v1562_v31 }
 0xc38   : > { %v1564_v33 = vpack.c.bf16 %v1563_v55, %v1563_v55 }
 0xc3a   : > { %1885 = vmatmul.mubr.msk.bf16.vlgmr.msra.gmra.mrb[24].mxu0 %vm730_vm14, %v1564_v33 }
 0xd0d   : > { %v1614_v36 = vpop.f32.mrb[24].mxu0 }
 0xd0e   : > { %v1615_v37 = vadd.f32 %v1614_v36, %v259_v25  ;;  %v1886_v38 = vpop.f32.mrb[25].mxu0 }
 0xd0f   : > { %v1617_v4 = vpop.f32.mrb[26].mxu0 }
 0xd10   : > { %v1887_v39 = vpop.f32.mrb[27].mxu0  ;;  %1621 = vst.msk [vmem:[%s204_s23] sm:$0x1] %vm1620_vm8, %v1615_v37 }
 0xd11   : > { %2054 = shalt.err (!%p2051_p3)
}
 0xd12   : > { %s2055_s9 = scalar_lea.hbm %s2462_s30, 16  ;;  %s2059_s12 = scalar_lea.hbm %s2508_s4, 64 }
 0xd13   : > { %p2056_p4 = scmp.ne.s32.totalorder %s2462_s30, %s2055_s9  ;;  %p2060_p9 = scmp.lt.u32.totalorder %s2462_s30, %s2508_s4 }
 0xd14   : > { %p2061_p10 = scmp.lt.u32.totalorder %s2059_s12, %s2055_s9  ;;  %p2063_p12 = scmp.lt.u32.totalorder %s2055_s9, %s2462_s30 }
 0xd15   : > { %p2057_p7 = pnand %p2056_p4, %p2174_p5 }
 0xd16   : > { %p2062_p11 = por %p2061_p10, %p2060_p9 }
 0xd17   : > { %p2058_p8 = pneg %p2057_p7 }
 0xd18   : > { %p2064_p13 = por %p2063_p12, %p2062_p11 }
 0xd1a   : > { %p2065_p0 = pnand %p2064_p13, %p2058_p8 }
 0xd1c   : > { %2068 = shalt.err (!%p2065_p0)
}
 0xd1d   : > { %1888 = dma.vmem_to_hbm [thread:$0]  (%p2174_p5), %s2464_s27, 16, %s2462_s30, %s1623_s19  }
 0xd1e PF: > { %p1894_p1 = scmp.ge.s32.totalorder %s2103_s18, 2  ;;  %s1647_s20 = sand.u32 1, %s2091_s15  }
 0xd1f   : > { %s1648_s22 = scalar_lea.sflag [#allocation3], %s1647_s20 }
 0xd20   : > { %p1891_p2 = pnand %p1894_p1, %p2178_p6 }
 0xd22   : > { %2086 = dma.done.wait (!%p1891_p2), %s1648_s22, 16  }
 0xd23   : > { %2088 = vsyncadd (!%p1891_p2), %s1648_s22, 4294967280  ;;  %p14_p3 = scmp.ge.s32.totalorder %s2161_s21, 6   ;;  %s2527_s15 = smov %s2095_s16 }
 0xd24   : > { %s2528_s16 = smov %s2099_s17  ;;  %s2529_s17 = smov %s2172_s24 }
 0xd25   : > { %s2530_s18 = smov %s2161_s21  ;;  %16 = sbr.rel (!%p14_p3) target bundleno = 3 (0x3), region = 74 }
 0xd2c   :  { %1652 = vsyncpa [#allocation3], 1 }
 0xd2d   :  { %1654 = vsyncpa [#allocation3 + $0x1], 1 }

</bundles_post_ra>
